<compile_context>
chip_gen: v7x
topology: tpu7x:2x2x1
jax: 0.10.0
libtpu: 0.0.40
codegen_flags: <defaults>
</compile_context>

<pallas_src>
import functools
import math

import jax
import jax.numpy as jnp
from jax import lax
from jax.experimental import pallas as pl
from jax.experimental.pallas import tpu as pltpu


def _round_up(x, m):
    return (x + m - 1) // m * m


# ---------------------------------------------------------------------------
# Pallas kernel: implicit-im2col conv (stride-1 taps) + bias, f32 accumulation.
# ---------------------------------------------------------------------------
def _conv_kernel(x_ref, w_ref, b_ref, o_ref, *, KH, KW, dil, t_oh, OW, Cin, OCp):
    # x_ref: (Hp, Wp, Cin)      bf16 - full padded image for this batch element (resident)
    # w_ref: (KH*KW, Cin, OCp)  bf16 - resident across the whole grid
    # b_ref: (1, OCp)           f32  - resident
    # o_ref: (t_oh*OW, OCp)     f32  - one tile of output rows for this image (lane-dense)
    r = pl.program_id(1)
    row0 = pl.multiple_of(r * t_oh, t_oh)          # first output row of this tile

    acc = jnp.zeros((t_oh * OW, OCp), jnp.float32)
    # Unrolled kh/kw tap loop: each tap is a shifted window of the resident image.
    for kh in range(KH):
        for kw in range(KW):
            patch = x_ref[pl.ds(row0 + kh * dil, t_oh), pl.ds(kw * dil, OW), :]
            patch = patch.reshape(t_oh * OW, Cin)              # (TM, Cin) bf16
            acc = acc + jnp.dot(patch, w_ref[kh * KW + kw],    # (Cin, OCp) bf16
                                preferred_element_type=jnp.float32)
    o_ref[...] = acc + b_ref[...]


def _fused_conv_s1(x_pad, w_taps, b_row, *, KH, KW, dil, OH1, OW1, t_oh):
    """Stride-1 conv of padded NHWC bf16 input. Returns (N, OH1*OW1, OCp) f32."""
    N, Hp, Wp, Cin = x_pad.shape
    OCp = w_taps.shape[-1]
    M_img = OH1 * OW1

    kern = functools.partial(_conv_kernel, KH=KH, KW=KW, dil=dil,
                             t_oh=t_oh, OW=OW1, Cin=Cin, OCp=OCp)

    flops = 2 * N * M_img * KH * KW * Cin * OCp
    bytes_acc = (x_pad.size * 2 + w_taps.size * 2 + b_row.size * 4
                 + N * M_img * OCp * 4)

    return pl.pallas_call(
        kern,
        out_shape=jax.ShapeDtypeStruct((N, M_img, OCp), jnp.float32),
        grid_spec=pltpu.PrefetchScalarGridSpec(
            num_scalar_prefetch=0,
            grid=(N, OH1 // t_oh),
            in_specs=[
                # Full padded image per batch element; constant over the row-tile
                # axis -> stays resident in VMEM across its row tiles.
                # (For very large images this block would need an extra H tiling
                #  with halo via manual DMA; fine at these scales.)
                pl.BlockSpec((None, Hp, Wp, Cin), lambda n, r: (n, 0, 0, 0)),
                pl.BlockSpec((KH * KW, Cin, OCp), lambda n, r: (0, 0, 0)),
                pl.BlockSpec((1, OCp), lambda n, r: (0, 0)),
            ],
            out_specs=pl.BlockSpec((None, t_oh * OW1, OCp), lambda n, r: (n, r, 0)),
        ),
        compiler_params=pltpu.CompilerParams(
            dimension_semantics=("parallel", "parallel"),
            vmem_limit_bytes=32 * 1024 * 1024),
        cost_estimate=pl.CostEstimate(flops=flops, transcendentals=0,
                                      bytes_accessed=bytes_acc),
    )(x_pad, w_taps, b_row)


# ---------------------------------------------------------------------------
# Wrapper: layout plumbing + Bayesian sampling.
# ---------------------------------------------------------------------------
def bayes_conv2d_forward(x, weight, bias, stride=1, padding=0, dilation=1,
                         block_rows=512):
    """x: (N, Cin, H, W) f32; weight: (OC, Cin, KH, KW) f32; bias: (OC,) f32 or None."""
    N, Cin, H, W = x.shape
    OC, _, KH, KW = weight.shape

    # Stride-1 output extent.  Final stride is applied by subsampling the stride-1
    # result, which is exactly equivalent for conv.
    # TODO(synk): native strided path in the kernel (strided pl.ds) instead of
    # computing the stride-1 result and subsampling (exact, but extra work).
    OH1 = H + 2 * padding - dilation * (KH - 1)
    OW1 = W + 2 * padding - dilation * (KW - 1)
    assert OH1 > 0 and OW1 > 0, "conv output would be empty"

    OCp = _round_up(OC, 128)   # lane-dense output stores

    # Layout plumbing (XLA): NCHW -> padded NHWC bf16; weight -> (KH*KW, Cin, OCp) bf16.
    x_pad = jnp.pad(jnp.transpose(x, (0, 2, 3, 1)),
                    ((0, 0), (padding, padding), (padding, padding), (0, 0)))
    x_pad = x_pad.astype(jnp.bfloat16)

    w_taps = jnp.transpose(weight, (2, 3, 1, 0)).reshape(KH * KW, Cin, OC)
    w_taps = jnp.pad(w_taps, ((0, 0), (0, 0), (0, OCp - OC))).astype(jnp.bfloat16)

    if bias is None:
        b_row = jnp.zeros((1, OCp), jnp.float32)
    else:
        b_row = jnp.pad(bias.astype(jnp.float32), (0, OCp - OC)).reshape(1, OCp)

    # Output-row tile: largest divisor of OH1 whose (rows * OW1) is sublane-aligned
    # and at most `block_rows` GEMM rows (sweepable; sized well inside v7x's 32 MiB
    # scoped VMEM even with double buffering).
    candidates = [t for t in range(1, OH1 + 1)
                  if OH1 % t == 0 and (t * OW1) % 8 == 0 and t * OW1 <= block_rows]
    t_oh = max(candidates) if candidates else OH1

    out = _fused_conv_s1(x_pad, w_taps, b_row, KH=KH, KW=KW, dil=dilation,
                         OH1=OH1, OW1=OW1, t_oh=t_oh)        # (N, OH1*OW1, OCp)

    out = out.reshape(N, OH1, OW1, OCp)[..., :OC]
    out = jnp.transpose(out, (0, 3, 1, 2))                   # NCHW, stride-1 result
    if stride != 1:
        out = out[:, :, ::stride, ::stride]
    return out


class BayesGaussianConv2dPallas:
    """JAX/Pallas reimplementation of Bayes_Gaussion_Conv2d (training-mode forward)."""

    def __init__(self, in_channels, out_channels, kernel_size,
                 stride=1, padding=0, dilation=1, bias=True, key=None):
        self.in_channels = in_channels
        self.out_channels = out_channels
        self.kernel_size = (kernel_size if isinstance(kernel_size, tuple)
                            else (kernel_size, kernel_size))
        self.stride = stride
        self.padding = padding
        self.dilation = dilation
        self.use_bias = bias
        self.scale = 1.0
        self.train_sample_nums = 5

        # posterior init as in the PyTorch module
        post_mu_mean, post_mu_std = 0.0, 0.01
        post_rho_mean, post_rho_std = -4.0, 0.01

        key = jax.random.PRNGKey(0) if key is None else key
        k1, k2, k3, k4 = jax.random.split(key, 4)
        KH, KW = self.kernel_size
        wshape = (out_channels, in_channels, KH, KW)
        self.weight = post_mu_mean + post_mu_std * jax.random.normal(k1, wshape, jnp.float32)
        self.weight_rho = post_rho_mean + post_rho_std * jax.random.normal(k2, wshape, jnp.float32)
        if bias:
            self.bias = post_mu_mean + post_mu_std * jax.random.normal(k3, (out_channels,), jnp.float32)
            self.bias_rho = post_rho_mean + post_rho_std * jax.random.normal(k4, (out_channels,), jnp.float32)
        else:
            self.bias = None
            self.bias_rho = None

    def sample_weight(self, nums, key):
        kw_key, kb_key = jax.random.split(key)
        weight_sigma = jax.nn.softplus(self.weight_rho)      # numerically safe log1p(exp(rho))
        # mean of `nums` i.i.d. reparameterized samples == mu + scale*sigma*eps/sqrt(nums)
        eps_w = jax.random.normal(kw_key, self.weight.shape, jnp.float32)
        weight = self.weight + (self.scale / math.sqrt(nums)) * weight_sigma * eps_w
        bias = None
        if self.bias is not None:
            bias_sigma = jax.nn.softplus(self.bias_rho)
            eps_b = jax.random.normal(kb_key, self.bias.shape, jnp.float32)
            bias = self.bias + (self.scale / math.sqrt(nums)) * bias_sigma * eps_b
        return weight, bias

    def __call__(self, x, key, block_rows=512):
        """x: (N, Cin, H, W) f32 -> (N, OC, OH, OW) f32 (training-mode forward)."""
        weight, bias = self.sample_weight(self.train_sample_nums, key)
        out = bayes_conv2d_forward(x, weight, bias, self.stride, self.padding,
                                   self.dilation, block_rows=block_rows)
        return out, weight, bias


if __name__ == "__main__":
    # Small shapes consistent with the module: N=2, Cin=4, H=W=16, 3x3 conv, pad=1.
    N, Cin, H, W = 2, 4, 16, 16
    Cout, ksize, stride, pad = 8, 3, 1, 1

    root = jax.random.PRNGKey(0)
    k_param, k_input, k_sample = jax.random.split(root, 3)

    mod = BayesGaussianConv2dPallas(Cin, Cout, ksize, stride=stride, padding=pad,
                                    dilation=1, bias=True, key=k_param)
    x = jax.random.normal(k_input, (N, Cin, H, W), jnp.float32)

    # Small row tile so the demo exercises >1 output-row tile per image (grid = (2, 2)).
    out, w_sampled, b_sampled = mod(x, k_sample, block_rows=128)
    out = jax.block_until_ready(out)
    assert out.shape == (N, Cout, H, W)

    # Reference: XLA conv with the same bf16-input / f32-accumulate numerics.
    ref = lax.conv_general_dilated(
        jnp.transpose(x, (0, 2, 3, 1)).astype(jnp.bfloat16),
        jnp.transpose(w_sampled, (2, 3, 1, 0)).astype(jnp.bfloat16),
        window_strides=(stride, stride),
        padding=[(pad, pad), (pad, pad)],
        dimension_numbers=("NHWC", "HWIO", "NHWC"),
        preferred_element_type=jnp.float32,
    )
    ref = jnp.transpose(ref, (0, 3, 1, 2)) + b_sampled.reshape(1, Cout, 1, 1)

    max_err = float(jnp.max(jnp.abs(out - ref)))
    assert max_err < 2e-3, f"max abs err {max_err}"
    print("KERNEL_OK")
</pallas_src>

<mosaic_0001>
module attributes {stable_mosaic.version = 11 : i64} {
  func.func @_conv_kernel(%arg0: i32, %arg1: i32, %arg2: memref<1x18x18x4xbf16, #tpu.memory_space<vmem>>, %arg3: memref<9x4x128xbf16, #tpu.memory_space<vmem>>, %arg4: memref<1x128xf32, #tpu.memory_space<vmem>>, %arg5: memref<1x128x128xf32, #tpu.memory_space<vmem>>) attributes {dimension_semantics = [#tpu.dimension_semantics<parallel>, #tpu.dimension_semantics<parallel>], iteration_bounds = array<i64: 2, 2>, scalar_prefetch = 0 : i64, scratch_operands = 0 : i64, tpu.core_type = #tpu.core_type<tc>, window_params = [{transform_indices = @transform_0, window_bounds = array<i64: 1, 18, 18, 4>}, {pipeline_mode = #tpu.pipeline_mode<synchronous>, transform_indices = @transform_1, window_bounds = array<i64: 9, 4, 128>}, {pipeline_mode = #tpu.pipeline_mode<synchronous>, transform_indices = @transform_2, window_bounds = array<i64: 1, 128>}, {transform_indices = @transform_3, window_bounds = array<i64: 1, 128, 128>}]} {
    %c8_i32 = arith.constant 8 : i32
    %0 = arith.muli %arg1, %c8_i32 : i32
    %1 = tpu.assume_multiple %0, 8 : i32
    %cst = arith.constant 0.000000e+00 : f32
    %2 = vector.broadcast %cst : f32 to vector<128x128xf32>
    %c0_i32 = arith.constant 0 : i32
    %3 = arith.addi %1, %c0_i32 : i32
    %c0 = arith.constant 0 : index
    %4 = arith.index_cast %3 : i32 to index
    %c0_0 = arith.constant 0 : index
    %c0_1 = arith.constant 0 : index
    %5 = vector.load %arg2[%c0, %4, %c0_0, %c0_1] : memref<1x18x18x4xbf16, #tpu.memory_space<vmem>>, vector<1x8x16x4xbf16>
    %6 = vector.shape_cast %5 : vector<1x8x16x4xbf16> to vector<8x16x4xbf16>
    %7 = vector.shape_cast %6 : vector<8x16x4xbf16> to vector<128x4xbf16>
    %c0_2 = arith.constant 0 : index
    %c0_3 = arith.constant 0 : index
    %c0_4 = arith.constant 0 : index
    %8 = vector.load %arg3[%c0_2, %c0_3, %c0_4] : memref<9x4x128xbf16, #tpu.memory_space<vmem>>, vector<1x4x128xbf16>
    %9 = vector.shape_cast %8 : vector<1x4x128xbf16> to vector<4x128xbf16>
    %cst_5 = arith.constant dense<0.000000e+00> : vector<128x128xf32>
    %10 = tpu.matmul %7, %9, %cst_5 {dimension_numbers = #tpu.dot_dimension_numbers<[1], [0], [0], [1], [0, 0, 1, 1], [], []>} : vector<128x4xbf16>, vector<4x128xbf16>, vector<128x128xf32> -> vector<128x128xf32>
    %11 = arith.addf %2, %10 : vector<128x128xf32>
    %c0_i32_6 = arith.constant 0 : i32
    %12 = arith.addi %1, %c0_i32_6 : i32
    %c0_7 = arith.constant 0 : index
    %13 = arith.index_cast %12 : i32 to index
    %c1 = arith.constant 1 : index
    %c0_8 = arith.constant 0 : index
    %14 = vector.load %arg2[%c0_7, %13, %c1, %c0_8] : memref<1x18x18x4xbf16, #tpu.memory_space<vmem>>, vector<1x8x16x4xbf16>
    %15 = vector.shape_cast %14 : vector<1x8x16x4xbf16> to vector<8x16x4xbf16>
    %16 = vector.shape_cast %15 : vector<8x16x4xbf16> to vector<128x4xbf16>
    %c1_9 = arith.constant 1 : index
    %c0_10 = arith.constant 0 : index
    %c0_11 = arith.constant 0 : index
    %17 = vector.load %arg3[%c1_9, %c0_10, %c0_11] : memref<9x4x128xbf16, #tpu.memory_space<vmem>>, vector<1x4x128xbf16>
    %18 = vector.shape_cast %17 : vector<1x4x128xbf16> to vector<4x128xbf16>
    %cst_12 = arith.constant dense<0.000000e+00> : vector<128x128xf32>
    %19 = tpu.matmul %16, %18, %cst_12 {dimension_numbers = #tpu.dot_dimension_numbers<[1], [0], [0], [1], [0, 0, 1, 1], [], []>} : vector<128x4xbf16>, vector<4x128xbf16>, vector<128x128xf32> -> vector<128x128xf32>
    %20 = arith.addf %11, %19 : vector<128x128xf32>
    %c0_i32_13 = arith.constant 0 : i32
    %21 = arith.addi %1, %c0_i32_13 : i32
    %c0_14 = arith.constant 0 : index
    %22 = arith.index_cast %21 : i32 to index
    %c2 = arith.constant 2 : index
    %c0_15 = arith.constant 0 : index
    %23 = vector.load %arg2[%c0_14, %22, %c2, %c0_15] : memref<1x18x18x4xbf16, #tpu.memory_space<vmem>>, vector<1x8x16x4xbf16>
    %24 = vector.shape_cast %23 : vector<1x8x16x4xbf16> to vector<8x16x4xbf16>
    %25 = vector.shape_cast %24 : vector<8x16x4xbf16> to vector<128x4xbf16>
    %c2_16 = arith.constant 2 : index
    %c0_17 = arith.constant 0 : index
    %c0_18 = arith.constant 0 : index
    %26 = vector.load %arg3[%c2_16, %c0_17, %c0_18] : memref<9x4x128xbf16, #tpu.memory_space<vmem>>, vector<1x4x128xbf16>
    %27 = vector.shape_cast %26 : vector<1x4x128xbf16> to vector<4x128xbf16>
    %cst_19 = arith.constant dense<0.000000e+00> : vector<128x128xf32>
    %28 = tpu.matmul %25, %27, %cst_19 {dimension_numbers = #tpu.dot_dimension_numbers<[1], [0], [0], [1], [0, 0, 1, 1], [], []>} : vector<128x4xbf16>, vector<4x128xbf16>, vector<128x128xf32> -> vector<128x128xf32>
    %29 = arith.addf %20, %28 : vector<128x128xf32>
    %c1_i32 = arith.constant 1 : i32
    %30 = arith.addi %1, %c1_i32 : i32
    %c0_20 = arith.constant 0 : index
    %31 = arith.index_cast %30 : i32 to index
    %c0_21 = arith.constant 0 : index
    %c0_22 = arith.constant 0 : index
    %32 = vector.load %arg2[%c0_20, %31, %c0_21, %c0_22] : memref<1x18x18x4xbf16, #tpu.memory_space<vmem>>, vector<1x8x16x4xbf16>
    %33 = vector.shape_cast %32 : vector<1x8x16x4xbf16> to vector<8x16x4xbf16>
    %34 = vector.shape_cast %33 : vector<8x16x4xbf16> to vector<128x4xbf16>
    %c3 = arith.constant 3 : index
    %c0_23 = arith.constant 0 : index
    %c0_24 = arith.constant 0 : index
    %35 = vector.load %arg3[%c3, %c0_23, %c0_24] : memref<9x4x128xbf16, #tpu.memory_space<vmem>>, vector<1x4x128xbf16>
    %36 = vector.shape_cast %35 : vector<1x4x128xbf16> to vector<4x128xbf16>
    %cst_25 = arith.constant dense<0.000000e+00> : vector<128x128xf32>
    %37 = tpu.matmul %34, %36, %cst_25 {dimension_numbers = #tpu.dot_dimension_numbers<[1], [0], [0], [1], [0, 0, 1, 1], [], []>} : vector<128x4xbf16>, vector<4x128xbf16>, vector<128x128xf32> -> vector<128x128xf32>
    %38 = arith.addf %29, %37 : vector<128x128xf32>
    %c1_i32_26 = arith.constant 1 : i32
    %39 = arith.addi %1, %c1_i32_26 : i32
    %c0_27 = arith.constant 0 : index
    %40 = arith.index_cast %39 : i32 to index
    %c1_28 = arith.constant 1 : index
    %c0_29 = arith.constant 0 : index
    %41 = vector.load %arg2[%c0_27, %40, %c1_28, %c0_29] : memref<1x18x18x4xbf16, #tpu.memory_space<vmem>>, vector<1x8x16x4xbf16>
    %42 = vector.shape_cast %41 : vector<1x8x16x4xbf16> to vector<8x16x4xbf16>
    %43 = vector.shape_cast %42 : vector<8x16x4xbf16> to vector<128x4xbf16>
    %c4 = arith.constant 4 : index
    %c0_30 = arith.constant 0 : index
    %c0_31 = arith.constant 0 : index
    %44 = vector.load %arg3[%c4, %c0_30, %c0_31] : memref<9x4x128xbf16, #tpu.memory_space<vmem>>, vector<1x4x128xbf16>
    %45 = vector.shape_cast %44 : vector<1x4x128xbf16> to vector<4x128xbf16>
    %cst_32 = arith.constant dense<0.000000e+00> : vector<128x128xf32>
    %46 = tpu.matmul %43, %45, %cst_32 {dimension_numbers = #tpu.dot_dimension_numbers<[1], [0], [0], [1], [0, 0, 1, 1], [], []>} : vector<128x4xbf16>, vector<4x128xbf16>, vector<128x128xf32> -> vector<128x128xf32>
    %47 = arith.addf %38, %46 : vector<128x128xf32>
    %c1_i32_33 = arith.constant 1 : i32
    %48 = arith.addi %1, %c1_i32_33 : i32
    %c0_34 = arith.constant 0 : index
    %49 = arith.index_cast %48 : i32 to index
    %c2_35 = arith.constant 2 : index
    %c0_36 = arith.constant 0 : index
    %50 = vector.load %arg2[%c0_34, %49, %c2_35, %c0_36] : memref<1x18x18x4xbf16, #tpu.memory_space<vmem>>, vector<1x8x16x4xbf16>
    %51 = vector.shape_cast %50 : vector<1x8x16x4xbf16> to vector<8x16x4xbf16>
    %52 = vector.shape_cast %51 : vector<8x16x4xbf16> to vector<128x4xbf16>
    %c5 = arith.constant 5 : index
    %c0_37 = arith.constant 0 : index
    %c0_38 = arith.constant 0 : index
    %53 = vector.load %arg3[%c5, %c0_37, %c0_38] : memref<9x4x128xbf16, #tpu.memory_space<vmem>>, vector<1x4x128xbf16>
    %54 = vector.shape_cast %53 : vector<1x4x128xbf16> to vector<4x128xbf16>
    %cst_39 = arith.constant dense<0.000000e+00> : vector<128x128xf32>
    %55 = tpu.matmul %52, %54, %cst_39 {dimension_numbers = #tpu.dot_dimension_numbers<[1], [0], [0], [1], [0, 0, 1, 1], [], []>} : vector<128x4xbf16>, vector<4x128xbf16>, vector<128x128xf32> -> vector<128x128xf32>
    %56 = arith.addf %47, %55 : vector<128x128xf32>
    %c2_i32 = arith.constant 2 : i32
    %57 = arith.addi %1, %c2_i32 : i32
    %c0_40 = arith.constant 0 : index
    %58 = arith.index_cast %57 : i32 to index
    %c0_41 = arith.constant 0 : index
    %c0_42 = arith.constant 0 : index
    %59 = vector.load %arg2[%c0_40, %58, %c0_41, %c0_42] : memref<1x18x18x4xbf16, #tpu.memory_space<vmem>>, vector<1x8x16x4xbf16>
    %60 = vector.shape_cast %59 : vector<1x8x16x4xbf16> to vector<8x16x4xbf16>
    %61 = vector.shape_cast %60 : vector<8x16x4xbf16> to vector<128x4xbf16>
    %c6 = arith.constant 6 : index
    %c0_43 = arith.constant 0 : index
    %c0_44 = arith.constant 0 : index
    %62 = vector.load %arg3[%c6, %c0_43, %c0_44] : memref<9x4x128xbf16, #tpu.memory_space<vmem>>, vector<1x4x128xbf16>
    %63 = vector.shape_cast %62 : vector<1x4x128xbf16> to vector<4x128xbf16>
    %cst_45 = arith.constant dense<0.000000e+00> : vector<128x128xf32>
    %64 = tpu.matmul %61, %63, %cst_45 {dimension_numbers = #tpu.dot_dimension_numbers<[1], [0], [0], [1], [0, 0, 1, 1], [], []>} : vector<128x4xbf16>, vector<4x128xbf16>, vector<128x128xf32> -> vector<128x128xf32>
    %65 = arith.addf %56, %64 : vector<128x128xf32>
    %c2_i32_46 = arith.constant 2 : i32
    %66 = arith.addi %1, %c2_i32_46 : i32
    %c0_47 = arith.constant 0 : index
    %67 = arith.index_cast %66 : i32 to index
    %c1_48 = arith.constant 1 : index
    %c0_49 = arith.constant 0 : index
    %68 = vector.load %arg2[%c0_47, %67, %c1_48, %c0_49] : memref<1x18x18x4xbf16, #tpu.memory_space<vmem>>, vector<1x8x16x4xbf16>
    %69 = vector.shape_cast %68 : vector<1x8x16x4xbf16> to vector<8x16x4xbf16>
    %70 = vector.shape_cast %69 : vector<8x16x4xbf16> to vector<128x4xbf16>
    %c7 = arith.constant 7 : index
    %c0_50 = arith.constant 0 : index
    %c0_51 = arith.constant 0 : index
    %71 = vector.load %arg3[%c7, %c0_50, %c0_51] : memref<9x4x128xbf16, #tpu.memory_space<vmem>>, vector<1x4x128xbf16>
    %72 = vector.shape_cast %71 : vector<1x4x128xbf16> to vector<4x128xbf16>
    %cst_52 = arith.constant dense<0.000000e+00> : vector<128x128xf32>
    %73 = tpu.matmul %70, %72, %cst_52 {dimension_numbers = #tpu.dot_dimension_numbers<[1], [0], [0], [1], [0, 0, 1, 1], [], []>} : vector<128x4xbf16>, vector<4x128xbf16>, vector<128x128xf32> -> vector<128x128xf32>
    %74 = arith.addf %65, %73 : vector<128x128xf32>
    %c2_i32_53 = arith.constant 2 : i32
    %75 = arith.addi %1, %c2_i32_53 : i32
    %c0_54 = arith.constant 0 : index
    %76 = arith.index_cast %75 : i32 to index
    %c2_55 = arith.constant 2 : index
    %c0_56 = arith.constant 0 : index
    %77 = vector.load %arg2[%c0_54, %76, %c2_55, %c0_56] : memref<1x18x18x4xbf16, #tpu.memory_space<vmem>>, vector<1x8x16x4xbf16>
    %78 = vector.shape_cast %77 : vector<1x8x16x4xbf16> to vector<8x16x4xbf16>
    %79 = vector.shape_cast %78 : vector<8x16x4xbf16> to vector<128x4xbf16>
    %c8 = arith.constant 8 : index
    %c0_57 = arith.constant 0 : index
    %c0_58 = arith.constant 0 : index
    %80 = vector.load %arg3[%c8, %c0_57, %c0_58] : memref<9x4x128xbf16, #tpu.memory_space<vmem>>, vector<1x4x128xbf16>
    %81 = vector.shape_cast %80 : vector<1x4x128xbf16> to vector<4x128xbf16>
    %cst_59 = arith.constant dense<0.000000e+00> : vector<128x128xf32>
    %82 = tpu.matmul %79, %81, %cst_59 {dimension_numbers = #tpu.dot_dimension_numbers<[1], [0], [0], [1], [0, 0, 1, 1], [], []>} : vector<128x4xbf16>, vector<4x128xbf16>, vector<128x128xf32> -> vector<128x128xf32>
    %83 = arith.addf %74, %82 : vector<128x128xf32>
    %c0_60 = arith.constant 0 : index
    %c0_61 = arith.constant 0 : index
    %84 = vector.load %arg4[%c0_60, %c0_61] : memref<1x128xf32, #tpu.memory_space<vmem>>, vector<1x128xf32>
    %85 = vector.broadcast %84 : vector<1x128xf32> to vector<128x128xf32>
    %86 = arith.addf %83, %85 : vector<128x128xf32>
    %c0_62 = arith.constant 0 : index
    %c0_63 = arith.constant 0 : index
    %c0_64 = arith.constant 0 : index
    %87 = vector.load %arg5[%c0_62, %c0_63, %c0_64] : memref<1x128x128xf32, #tpu.memory_space<vmem>>, vector<1x128x128xf32>
    %88 = vector.shape_cast %87 : vector<1x128x128xf32> to vector<128x128xf32>
    %89 = vector.shape_cast %86 : vector<128x128xf32> to vector<1x128x128xf32>
    tpu.vector_store %arg5[%c0_62, %c0_63, %c0_64], %89 {strides = array<i32>} : memref<1x128x128xf32, #tpu.memory_space<vmem>>, vector<1x128x128xf32>,
    return
  }
  func.func @transform_0(%arg0: i32, %arg1: i32) -> (i32, i32, i32, i32) {
    %c0_i32 = arith.constant 0 : i32
    %c0_i32_0 = arith.constant 0 : i32
    %c0_i32_1 = arith.constant 0 : i32
    %c0_i32_2 = arith.constant 0 : i32
    return %arg0, %c0_i32, %c0_i32_0, %c0_i32_1 : i32, i32, i32, i32
  }
  func.func @transform_1(%arg0: i32, %arg1: i32) -> (i32, i32, i32) {
    %c0_i32 = arith.constant 0 : i32
    %c0_i32_0 = arith.constant 0 : i32
    %c0_i32_1 = arith.constant 0 : i32
    %c0_i32_2 = arith.constant 0 : i32
    return %c0_i32, %c0_i32_0, %c0_i32_1 : i32, i32, i32
  }
  func.func @transform_2(%arg0: i32, %arg1: i32) -> (i32, i32) {
    %c0_i32 = arith.constant 0 : i32
    %c0_i32_0 = arith.constant 0 : i32
    %c0_i32_1 = arith.constant 0 : i32
    return %c0_i32, %c0_i32_0 : i32, i32
  }
  func.func @transform_3(%arg0: i32, %arg1: i32) -> (i32, i32, i32) {
    %c0_i32 = arith.constant 0 : i32
    %c0_i32_0 = arith.constant 0 : i32
    return %arg0, %arg1, %c0_i32 : i32, i32, i32
  }
}

</mosaic_0001>

<bundles_post_ra>
// kernel: tpu_custom_call.1
= control target key start
LH: loop header
LB: loop body
LE: loop exit
PB: predicated region body
PF: predicated region fallthrough
CT: control target
= control target key end

     0   :  { %8 = vsyncpa [#allocation3], 0  ;;  %s4726_s0 = inlined_call_operand.vmem [shape: bf16[2,18,18,4], index: 0, kind: input, shape index: {}]   ;;  %s4727_s1 = inlined_call_operand.vmem [shape: bf16[9,4,128], index: 1, kind: input, shape index: {}]   ;;  %s4728_s2 = inlined_call_operand.vmem [shape: f32[1,128], index: 2, kind: input, shape index: {}]   ;;  %s4729_s3 = inlined_call_operand.hbm [shape: f32[2,256,128], index: 3, kind: output, shape index: {}]  }
   0x1   :  { %10 = vsyncpa [#allocation3 + $0x1], 0  ;;  %s3686_s12 = smov 0   ;;  %s3688_s13 = smov 0  }
   0x2   :  { %s3690_s14 = smov 0   ;;  %s3692_s15 = smov 0  }
   0x3   :  { %s3694_s16 = smov 0   ;;  %s3696_s17 = smov 0  }
   0x4   :  { %s3698_s18 = smov 0   ;;  %s3700_s19 = smov 0  }
   0x5 LB: > { %s2791_s20 = sadd.s32 4294967295, %s3661_s19   ;;  %s2792_s21 = sadd.s32 4294967294, %s3661_s19   ;;  %s3661_s19 = sphi %s3700_s19, %s16_s19   ;;  %s3657_s18 = sphi %s3698_s18, %s4760_s18   ;;  %s3653_s17 = sphi %s3696_s17, %s4759_s17   ;;  %s3649_s16 = sphi %s3694_s16, %s4758_s16   ;;  %s3645_s15 = sphi %s3692_s15, %s4757_s15   ;;  %s3641_s14 = sphi %s3690_s14, %s4756_s14   ;;  %s3637_s13 = sphi %s3688_s13, %s4755_s13   ;;  %s3633_s12 = sphi %s3686_s12, %s4754_s12  }
   0x6   : > { %s25_s22 = sadd.s32 1, %s3653_s17  ;;  %s28_s23 = sadd.s32 1, %s3657_s18 }
   0x7   : > { %p26_p0 = scmp.ge.s32.totalorder %s25_s22, 2  ;;  %p115_p1 = scmp.ne.s32.totalorder %s3641_s14, %s3637_s13 }
   0x8   : > { %p116_p2 = scmp.eq.s32.totalorder %s2791_s20, 3  ;;  %p121_p5 = scmp.ne.s32.totalorder %s3637_s13, %s3633_s12 }
   0x9   : > { %s4762_s22 = smov (%p26_p0, %s25_s22), 0  ;;  %s4764_s23 = smov (!%p26_p0, %s28_s23), %s3657_s18 }
   0xa   : > { %s101_s24 = ssub.s32 %s3653_s17, %s4762_s22  ;;  %p3737_p3 = por %p116_p2, %p115_p1 }
   0xb   : > { %p30_p4 = scmp.ge.s32.totalorder %s4764_s23, 2  ;;  %p122_p6 = scmp.eq.s32.totalorder %s2792_s21, 3 }
   0xc   : > { %p2795_p7 = scmp.ge.s32.totalorder %s3661_s19, 1  ;;  %p154_p9 = scmp.lt.s32.totalorder %s3661_s19, 5 }
   0xd   : > { %s4766_s23 = smov (%p30_p4, %s4764_s23), 0  ;;  %p3746_p8 = por %p122_p6, %p121_p5 }
   0xe   : > { %s100_s27 = ssub.s32 %s3657_s18, %s4766_s23  ;;  %s105_s28 = sadd.s32 1, %s3641_s14 }
   0xf   : > { %s102_s29 = sor.u32 %s101_s24, %s100_s27  ;;  %p155_p10 = pnand %p2795_p7, %p154_p9 }
  0x10   : > { %p103_p11 = scmp.eq.s32.totalorder %s102_s29, 0 }
  0x11   : > { %158 = sbr.rel (%p155_p10) target bundleno = 442 (0x1ba), region = 32 }
  0x12   : > { %s3755_s30 = scalar_select %p103_p11, %s3641_s14, %s105_s28  }
  0x18   : > { %v2801_v0 = vld [vmem:[%s4727_s1 + $0x2] sm:$0x3]  ;;  %vm460_vm0 = vcmask 1041408   ;;  %v2918_v1 = vld [vmem:[%s4727_s1 + $0x8] sm:$0x3]  ;;  %p178_p12 = scmp.lt.s32.totalorder %s3649_s16, 1 }
  0x19   : > { %3458 = vmatprep.subr.msk.bf16.mxu1 %vm460_vm0, %v2801_v0  ;;  %3462 = vmatprep.subr.msk.bf16.mxu0 %vm460_vm0, %v2918_v1  ;;  %v462_v2 = vsel %vm460_vm0, %v2801_v0, 0  ;;  %v3768_v3 = vsel %vm460_vm0, %v2918_v1, 0  ;;  %v205_v4 = vld [vmem:[%s4727_s1] sm:$0x3]  ;;  %s3084_s11 = smul.u32 96, %s3645_s15  ;;  %vm435_vm3 = vcmask 31744  }
  0x1a   : > { %3167 = vmatpush3.bf16.msra.mxu1 %v462_v2  ;;  %3239 = vmatpush3.bf16.msra.mxu0 %v3768_v3  ;;  %s179_s8 = scalar_select %p178_p12, %s3649_s16, 1  ;;  %v2951_v5 = vld [vmem:[%s4727_s1 + $0xa] sm:$0x3]  ;;  %vm214_vm1 = vsmask.f32 3328  ;;  %v3808_v17 = vsel %vm460_vm0, %v205_v4, 0 }
  0x1b   : > { %3459 = vmatprep.subr.msk.bf16.mxu1 %vm460_vm0, %v205_v4  ;;  %3464 = vmatprep.subr.msk.bf16.mxu0 %vm460_vm0, %v2951_v5  ;;  %vm215_vm2 = vsmask.f32 7440  ;;  %v3814_v26 = vld [vmem:[%s4727_s1 + $0xc] sm:$0x3]  ;;  %v3831_v37 = vsel %vm460_vm0, %v2951_v5, 0  ;;  %vm749_vm5 = vcmask 1042432  }
  0x1c   : > { %s3468_s24 = smul.u32 216, %s179_s8  ;;  %vm3823_vm4 = vmor %vm214_vm1, %vm215_vm2  ;;  %v3835_v41 = vsel %vm460_vm0, %v3814_v26, 0  ;;  %vm750_vm6 = vcmask 1046532   ;;  %v4626_v32 = vld [vmem:[%s4728_s2] ss:$0 sm:$0xff]  ;;  %s3079_s8 = sshll.u32 %s3645_s15, 4 }
  0x1d   : > { %vm3978_vm7 = vmor %vm749_vm5, %vm750_vm6  ;;  %s3080_s9 = sshll.u32 %s3649_s16, 5  ;;  %s3663_s28 = smov [#allocation2]  }
  0x1e   : > { %s182_s29 = scalar_lea.vmem %s4726_s0, %s3468_s24  ;;  %s2702_s10 = sadd.s32 %s3080_s9, %s3079_s8 }
  0x1f   : > { %s3784_s4 = scalar_lea.vmem %s182_s29, %s3084_s11  ;;  %s175_s29 = sand.u32 1, %s3637_s13  }
  0x20   : > { %v3787_v6 = vld [vmem:[%s3784_s4] sm:$0xf]  ;;  %v3790_v7 = vld [vmem:[%s3784_s4 + $0x4] sm:$0xf]  ;;  %v3793_v8 = vld [vmem:[%s3784_s4 + $0x8] sm:$0x1] }
  0x21   : > { %v218_v9 = vshrl.u32 %v3787_v6, 16  ;;  %v221_v10 = vshll.u32 %v3787_v6, 16  ;;  %v227_v11 = vshll.u32 %v3790_v7, 16  ;;  %v231_v12 = vshrl.u32 %v3790_v7, 16  ;;  %v2894_v13 = vld [vmem:[%s3784_s4 + $0xc] sm:$0xf] }
  0x22   : > { %v237_v14 = vshll.u32 %v3793_v8, 16  ;;  %v3802_v15 = vld [vmem:[%s3784_s4 + $0x10] sm:$0xf]  ;;  %v3805_v16 = vld [vmem:[%s3784_s4 + $0x14] sm:$0x1]  ;;  %v1201_v23 = vshrl.u32 %v2894_v13, 16 }
  0x23   : > { %v220_v18 = vrot.slane %v218_v9, 4  ;;  %v223_v19 = vrot.slane %v221_v10, 5  ;;  %v229_v20 = vrot.slane %v227_v11, 5  ;;  %v233_v21 = vrot.slane %v231_v12, 4  ;;  %v3819_v31 = vld [vmem:[%s3784_s4 + $0xc] sm:$0xf] }
  0x24   : > { %v239_v22 = vrot.slane %v237_v14, 5  ;;  %v1204_v24 = vshll.u32 %v2894_v13, 16  ;;  %v1210_v25 = vshll.u32 %v3802_v15, 16  ;;  %v1214_v29 = vshrl.u32 %v3802_v15, 16  ;;  %v3828_v36 = vld [vmem:[%s3784_s4 + $0x10] sm:$0xf] }
  0x25   : > { %v224_v27 = vor.u32 %v223_v19, %v220_v18  ;;  %v234_v28 = vor.u32 %v233_v21, %v229_v20  ;;  %v1220_v30 = vshll.u32 %v3805_v16, 16  ;;  %v1203_v33 = vrot.slane %v1201_v23, 4  ;;  %v3838_v44 = vld [vmem:[%s3784_s4 + $0x14] sm:$0x1]  ;;  %v2897_v55 = vld [vmem:[%s3784_s4 + $0x18] sm:$0xf] }
  0x26   : > { %v1206_v34 = vrot.slane %v1204_v24, 5  ;;  %v1212_v35 = vrot.slane %v1210_v25, 5  ;;  %v1216_v40 = vrot.slane %v1214_v29, 4  ;;  %v242_v45 = vshrl.u32 %v3819_v31, 16  ;;  %v3851_v60 = vld [vmem:[%s3784_s4 + $0x1c] sm:$0xf] }
  0x27   : > { %v225_v38 = vrot.slane %v224_v27, 4  ;;  %v235_v39 = vrot.slane %v234_v28, 4  ;;  %v1222_v43 = vrot.slane %v1220_v30, 5  ;;  %v245_v46 = vshll.u32 %v3819_v31, 16  ;;  %v3859_v1 = vld [vmem:[%s3784_s4 + $0x20] sm:$0x1] }
  0x28   : > { %v1207_v42 = vor.u32 %v1206_v34, %v1203_v33  ;;  %v1217_v49 = vor.u32 %v1216_v40, %v1212_v35  ;;  %v251_v50 = vshll.u32 %v3828_v36, 16  ;;  %v244_v53 = vrot.slane %v242_v45, 4  ;;  %v3867_v21 = vld [vmem:[%s3784_s4 + $0x18] sm:$0xf]  ;;  %v3874_v27 = vld [vmem:[%s3784_s4 + $0x1c] sm:$0xf] }
  0x29   : > { %v230_v47 = vsel %vm3823_vm4, %v225_v38, %v229_v20  ;;  %v240_v48 = vsel %vm3823_vm4, %v235_v39, %v239_v22  ;;  %v247_v54 = vrot.slane %v245_v46, 5  ;;  %v255_v58 = vshrl.u32 %v3828_v36, 16  ;;  %v3882_v38 = vld [vmem:[%s3784_s4 + $0x20] sm:$0x1]  ;;  %s3081_s15 = sshll.u32 %s2702_s10, 7  ;;  %s4674_s24 = scalar_lea.sflag [#allocation3], %s175_s29 }
  0x2a   : > { %v2802_v51 = vcombine.low %v230_v47, %v240_v48  ;;  %v1208_v52 = vrot.slane %v1207_v42, 4  ;;  %v1218_v56 = vrot.slane %v1217_v49, 4  ;;  %v253_v57 = vrot.slane %v251_v50, 5  ;;  %v2900_v47 = vld [vmem:[%s3784_s4 + $0x24] sm:$0xf]  ;;  %s4664_s21 = scalar_lea.hbm %s4729_s3, %s3081_s15 }
  0x2b   : > { %v261_v59 = vshll.u32 %v3838_v44, 16  ;;  %v1592_v62 = vrot.slane %v3802_v15, 5  ;;  %v1595_v63 = vrot.slane %v3805_v16, 5  ;;  %v248_v0 = vor.u32 %v247_v54, %v244_v53 }
  0x2c   : > { %3168 = vmatprep.mubr.msk.bf16.mxu1 %vm435_vm3, %v2802_v51  ;;  %v1213_v61 = vsel %vm3823_vm4, %v1208_v52, %v1212_v35  ;;  %v1223_v2 = vsel %vm3823_vm4, %v1218_v56, %v1222_v43  ;;  %v257_v4 = vrot.slane %v255_v58, 4  ;;  %v1225_v9 = vshrl.u32 %v2897_v55, 16  ;;  %v3892_v52 = vld [vmem:[%s3784_s4 + $0x28] sm:$0xf] }
  0x2d   : > { %v263_v5 = vrot.slane %v261_v59, 5  ;;  %v2919_v10 = vcombine.low %v1213_v61, %v1223_v2  ;;  %v249_v11 = vrot.slane %v248_v0, 4  ;;  %v1228_v12 = vshll.u32 %v2897_v55, 16  ;;  %v3904_v61 = vld [vmem:[%s3784_s4 + $0x2c] sm:$0x1] }
  0x2e   : > { %v1234_v13 = vshll.u32 %v3851_v60, 16  ;;  %v258_v14 = vor.u32 %v257_v4, %v253_v57  ;;  %v1227_v18 = vrot.slane %v1225_v9, 4  ;;  %v1238_v19 = vshrl.u32 %v3851_v60, 16 }
  0x2f   : > { %v1244_v20 = vshll.u32 %v3859_v1, 16  ;;  %3240 = vmatprep.mubr.msk.bf16.mxu0 %vm435_vm3, %v2919_v10  ;;  %v254_v22 = vsel %vm3823_vm4, %v249_v11, %v253_v57  ;;  %v1230_v23 = vrot.slane %v1228_v12, 5  ;;  %v1599_v25 = vrot.slane %v3851_v60, 5  ;;  %v3898_v57 = vld [vmem:[%s4727_s1 + $0x4] sm:$0x3] }
  0x30   : > { %v1236_v24 = vrot.slane %v1234_v13, 5  ;;  %v259_v28 = vrot.slane %v258_v14, 4  ;;  %v1240_v29 = vrot.slane %v1238_v19, 4  ;;  %v1602_v33 = vrot.slane %v3859_v1, 5  ;;  %v3911_v11 = vld [vmem:[%s3784_s4 + $0x24] sm:$0xf] }
  0x31   : > { %v1246_v30 = vrot.slane %v1244_v20, 5  ;;  %v1231_v34 = vor.u32 %v1230_v23, %v1227_v18  ;;  %v3879_v35 = vrot.slane %v1599_v25, 4  ;;  %v266_v39 = vshrl.u32 %v3867_v21, 16  ;;  %v3914_v19 = vld [vmem:[%s3784_s4 + $0x28] sm:$0xf] }
  0x32   : > { %v269_v40 = vshll.u32 %v3867_v21, 16  ;;  %v264_v42 = vsel %vm3823_vm4, %v259_v28, %v263_v5  ;;  %v1241_v43 = vor.u32 %v1240_v29, %v1236_v24  ;;  %v275_v45 = vshll.u32 %v3874_v27, 16  ;;  %v3924_v29 = vld [vmem:[%s3784_s4 + $0x2c] sm:$0x1] }
  0x33   : > { %v279_v46 = vshrl.u32 %v3874_v27, 16  ;;  %v2803_v48 = vcombine.low %v254_v22, %v264_v42  ;;  %v1232_v49 = vrot.slane %v1231_v34, 4  ;;  %v268_v50 = vrot.slane %v266_v39, 4 }
  0x34   : > { %v271_v51 = vrot.slane %v269_v40, 5  ;;  %v1242_v53 = vrot.slane %v1241_v43, 4  ;;  %v277_v54 = vrot.slane %v275_v45, 5  ;;  %v285_v56 = vshll.u32 %v3882_v38, 16  ;;  %v2903_v45 = vld [vmem:[%s3784_s4 + $0x30] sm:$0xf] }
  0x35   : > { %v281_v55 = vrot.slane %v279_v46, 4  ;;  %3169 = vmatmul.mubr.msk.bf16.vlgmr.msra.gmra.mrb[0].mxu1 %vm435_vm3, %v2803_v48  ;;  %v1237_v58 = vsel %vm3823_vm4, %v1232_v49, %v1236_v24  ;;  %v1249_v0 = vshrl.u32 %v2900_v47, 16  ;;  %v1252_v2 = vshll.u32 %v2900_v47, 16 }
  0x36   : > { %v272_v59 = vor.u32 %v271_v51, %v268_v50  ;;  %3185 = vmatpush3.bf16.msra.mxu1 %v3808_v17  ;;  %v1247_v4 = vsel %vm3823_vm4, %v1242_v53, %v1246_v30  ;;  %v287_v9 = vrot.slane %v285_v56, 5  ;;  %v1258_v10 = vshll.u32 %v3892_v52, 16  ;;  %v3934_v50 = vld [vmem:[%s3784_s4 + $0x34] sm:$0xf] }
  0x37   : > { %v282_v5 = vor.u32 %v281_v55, %v277_v54  ;;  %v2920_v12 = vcombine.low %v1237_v58, %v1247_v4  ;;  %v1251_v14 = vrot.slane %v1249_v0, 4  ;;  %v1254_v18 = vrot.slane %v1252_v2, 5  ;;  %3460 = vmatprep.subr.msk.bf16.mxu1 %vm460_vm0, %v3898_v57  ;;  %v3944_v58 = vld [vmem:[%s3784_s4 + $0x38] sm:$0x1] }
  0x38   : > { %v273_v13 = vrot.slane %v272_v59, 4  ;;  %v1260_v20 = vrot.slane %v1258_v10, 5  ;;  %v1262_v22 = vshrl.u32 %v3892_v52, 16  ;;  %v1268_v23 = vshll.u32 %v3904_v61, 16 }
  0x39   : > { %v283_v17 = vrot.slane %v282_v5, 4  ;;  %3241 = vmatmul.mubr.msk.bf16.vlgmr.msra.gmra.mrb[0].mxu0 %vm435_vm3, %v2920_v12  ;;  %v1255_v28 = vor.u32 %v1254_v18, %v1251_v14  ;;  %v290_v30 = vshrl.u32 %v3911_v11, 16  ;;  %v293_v34 = vshll.u32 %v3911_v11, 16  ;;  %v3949_v14 = vld [vmem:[%s3784_s4 + $0x30] sm:$0xf] }
  0x3a   : > { %v278_v24 = vsel %vm3823_vm4, %v273_v13, %v277_v54  ;;  %3257 = vmatpush3.bf16.msra.mxu0 %v3831_v37  ;;  %v1264_v40 = vrot.slane %v1262_v22, 4  ;;  %v1270_v42 = vrot.slane %v1268_v23, 5  ;;  %v299_v43 = vshll.u32 %v3914_v19, 16  ;;  %v3955_v23 = vld [vmem:[%s3784_s4 + $0x34] sm:$0xf] }
  0x3b   : > { %v288_v39 = vsel %vm3823_vm4, %v283_v17, %v287_v9  ;;  %v1256_v47 = vrot.slane %v1255_v28, 4  ;;  %v292_v48 = vrot.slane %v290_v30, 4  ;;  %v295_v49 = vrot.slane %v293_v34, 5  ;;  %3465 = vmatprep.subr.msk.bf16.mxu0 %vm460_vm0, %v3814_v26 }
  0x3c   : > { %v2804_v46 = vcombine.low %v278_v24, %v288_v39  ;;  %v1265_v37 = vor.u32 %v1264_v40, %v1260_v20  ;;  %v301_v51 = vrot.slane %v299_v43, 5  ;;  %v303_v53 = vshrl.u32 %v3914_v19, 16  ;;  %v3960_v39 = vld [vmem:[%s3784_s4 + $0x38] sm:$0x1] }
  0x3d   : > { %v309_v54 = vshll.u32 %v3924_v29, 16  ;;  %v1261_v55 = vsel %vm3823_vm4, %v1256_v47, %v1260_v20  ;;  %v296_v56 = vor.u32 %v295_v49, %v292_v48  ;;  %v1273_v59 = vshrl.u32 %v2903_v45, 16 }
  0x3e   : > { %3172 = vmatprep.mubr.msk.bf16.mxu1 %vm435_vm3, %v2804_v46  ;;  %v1276_v0 = vshll.u32 %v2903_v45, 16  ;;  %v1266_v2 = vrot.slane %v1265_v37, 4  ;;  %v305_v26 = vrot.slane %v303_v53, 4  ;;  %v1282_v5 = vshll.u32 %v3934_v50, 16  ;;  %v2935_v37 = vld [vmem:[%s3784_s4 + $0xc] sm:$0xe] }
  0x3f   : > { %v311_v4 = vrot.slane %v309_v54, 5  ;;  %v297_v9 = vrot.slane %v296_v56, 4  ;;  %v1275_v10 = vrot.slane %v1273_v59, 4  ;;  %v1286_v13 = vshrl.u32 %v3934_v50, 16  ;;  %v3972_v56 = vld [vmem:[%s3784_s4 + $0x3c] sm:$0xf] }
  0x40   : > { %v1278_v12 = vrot.slane %v1276_v0, 5  ;;  %v1271_v18 = vsel %vm3823_vm4, %v1266_v2, %v1270_v42  ;;  %v306_v17 = vor.u32 %v305_v26, %v301_v51  ;;  %v1284_v20 = vrot.slane %v1282_v5, 5 }
  0x41   : > { %v1292_v22 = vshll.u32 %v3944_v58, 16  ;;  %v2921_v24 = vcombine.low %v1261_v55, %v1271_v18  ;;  %v302_v28 = vsel %vm3823_vm4, %v297_v9, %v301_v51  ;;  %v1288_v34 = vrot.slane %v1286_v13, 4  ;;  %v3986_v18 = vld [vmem:[%s3784_s4 + $0x44] sm:$0x1] }
  0x42   : > { %v1279_v30 = vor.u32 %v1278_v12, %v1275_v10  ;;  %v307_v40 = vrot.slane %v306_v17, 4  ;;  %v314_v42 = vshrl.u32 %v3949_v14, 16  ;;  %v317_v45 = vshll.u32 %v3949_v14, 16  ;;  %v2936_v17 = vld [vmem:[%s3784_s4 + $0x18] sm:$0xe] }
  0x43   : > { %v1294_v43 = vrot.slane %v1292_v22, 5  ;;  %3244 = vmatprep.mubr.msk.bf16.mxu0 %vm435_vm3, %v2921_v24  ;;  %v1289_v47 = vor.u32 %v1288_v34, %v1284_v20  ;;  %v323_v48 = vshll.u32 %v3955_v23, 16  ;;  %v327_v49 = vshrl.u32 %v3955_v23, 16 }
  0x44   : > { %v1280_v46 = vrot.slane %v1279_v30, 4  ;;  %v312_v51 = vsel %vm3823_vm4, %v307_v40, %v311_v4  ;;  %v316_v53 = vrot.slane %v314_v42, 4  ;;  %v319_v54 = vrot.slane %v317_v45, 5  ;;  %v3983_v4 = vld [vmem:[%s3784_s4 + $0x40] sm:$0xf] }
  0x45   : > { %v333_v55 = vshll.u32 %v3960_v39, 16  ;;  %v2805_v59 = vcombine.low %v302_v28, %v312_v51  ;;  %v1290_v2 = vrot.slane %v1289_v47, 4  ;;  %v325_v26 = vrot.slane %v323_v48, 5  ;;  %v3997_v30 = vld [vmem:[%s3784_s4 + $0x48] sm:$0xf] }
  0x46   : > { %v1285_v0 = vsel %vm3823_vm4, %v1280_v46, %v1284_v20  ;;  %v320_v9 = vor.u32 %v319_v54, %v316_v53  ;;  %v329_v10 = vrot.slane %v327_v49, 4  ;;  %v2943_v13 = vrot.slane %v2935_v37, 9 }
  0x47   : > { %v335_v12 = vrot.slane %v333_v55, 5  ;;  %3173 = vmatmul.mubr.msk.bf16.gmra.mrb[4].mxu1 %vm435_vm3, %v2805_v59  ;;  %v1295_v20 = vsel %vm3823_vm4, %v1290_v2, %v1294_v43  ;;  %v1594_v22 = vrot.slane %v1592_v62, 4  ;;  %v338_v24 = vshrl.u32 %v3972_v56, 16  ;;  %v4017_v55 = vld [vmem:[%s3784_s4 + $0x50] sm:$0x1] }
  0x48   : > { %v341_v28 = vshll.u32 %v3972_v56, 16  ;;  %v2922_v34 = vcombine.low %v1285_v0, %v1295_v20  ;;  %v321_v40 = vrot.slane %v320_v9, 4  ;;  %v330_v42 = vor.u32 %v329_v10, %v325_v26 }
  0x49   : > { %v1593_v45 = vsel %vm3978_vm7, %v2943_v13, %v1592_v62  ;;  %v1596_v43 = vsel %vm3978_vm7, %v1594_v22, %v1595_v63  ;;  %v340_v46 = vrot.slane %v338_v24, 4  ;;  %v347_v48 = vshll.u32 %v3983_v4, 16  ;;  %v4013_v62 = vld [vmem:[%s3784_s4 + $0x4c] sm:$0xf] }
  0x4a   : > { %v343_v47 = vrot.slane %v341_v28, 5  ;;  %3245 = vmatmul.mubr.msk.bf16.gmra.mrb[4].mxu0 %vm435_vm3, %v2922_v34  ;;  %v326_v49 = vsel %vm3823_vm4, %v321_v40, %v325_v26  ;;  %v331_v37 = vrot.slane %v330_v42, 4  ;;  %v2952_v15 = vcombine.low %v1593_v45, %v1596_v43  ;;  %v4035_v28 = vld [vmem:[%s3784_s4 + $0x54] sm:$0xf]  ;;  %v4046_v34 = vld [vmem:[%s4727_s1 + $0xe] sm:$0x3] }
  0x4b   : > { %v351_v51 = vshrl.u32 %v3983_v4, 16  ;;  %v349_v53 = vrot.slane %v347_v48, 5  ;;  %v357_v63 = vshll.u32 %v3986_v18, 16  ;;  %v2944_v54 = vrot.slane %v2936_v17, 9 }
  0x4c   : > { %v344_v16 = vor.u32 %v343_v47, %v340_v46  ;;  %v336_v59 = vsel %vm3823_vm4, %v331_v37, %v335_v12  ;;  %3258 = vmatprep.mubr.msk.bf16.mxu0 %vm435_vm3, %v2952_v15  ;;  %v1603_v2 = vsel %vm3978_vm7, %v3879_v35, %v1602_v33  ;;  %v362_v26 = vshrl.u32 %v3997_v30, 16  ;;  %v2937_v12 = vld [vmem:[%s3784_s4 + $0x24] sm:$0xe]  ;;  %v4051_v37 = vld [vmem:[%s3784_s4 + $0x58] sm:$0xf] }
  0x4d   : > { %v353_v0 = vrot.slane %v351_v51, 4  ;;  %v2806_v9 = vcombine.low %v326_v49, %v336_v59  ;;  %v359_v13 = vrot.slane %v357_v63, 5  ;;  %v1600_v17 = vsel %vm3978_vm7, %v2944_v54, %v1599_v25  ;;  %v4060_v54 = vld [vmem:[%s3784_s4 + $0x5c] sm:$0x1] }
  0x4e   : > { %v345_v10 = vrot.slane %v344_v16, 4  ;;  %v2953_v22 = vcombine.low %v1600_v17, %v1603_v2  ;;  %v364_v24 = vrot.slane %v362_v26, 4  ;;  %v365_v1 = vshll.u32 %v3997_v30, 16 }
  0x4f   : > { %v354_v20 = vor.u32 %v353_v0, %v349_v53  ;;  %3176 = vmatprep.mubr.msk.bf16.mxu1 %vm435_vm3, %v2806_v9  ;;  %v371_v35 = vshll.u32 %v4013_v62, 16  ;;  %v375_v60 = vshrl.u32 %v4013_v62, 16  ;;  %v381_v25 = vshll.u32 %v4017_v55, 16 }
  0x50   : > { %v350_v33 = vsel %vm3823_vm4, %v345_v10, %v349_v53  ;;  %v367_v42 = vrot.slane %v365_v1, 5  ;;  %v2945_v45 = vrot.slane %v2937_v12, 9  ;;  %v1606_v43 = vrot.slane %v3892_v52, 5  ;;  %v2938_v10 = vld [vmem:[%s3784_s4 + $0x30] sm:$0xe] }
  0x51   : > { %v355_v40 = vrot.slane %v354_v20, 4  ;;  %v373_v46 = vrot.slane %v371_v35, 5  ;;  %v377_v47 = vrot.slane %v375_v60, 4  ;;  %v383_v48 = vrot.slane %v381_v25, 5 }
  0x52   : > { %v1609_v49 = vrot.slane %v3904_v61, 5  ;;  %3259 = vmatmul.mubr.msk.bf16.vlgmr.msra.gmra.mrb[0].mxu0 %vm435_vm3, %v2953_v22  ;;  %v368_v51 = vor.u32 %v367_v42, %v364_v24  ;;  %v1607_v16 = vsel %vm3978_vm7, %v2945_v45, %v1606_v43  ;;  %v1608_v53 = vrot.slane %v1606_v43, 4  ;;  %v4081_v42 = vld [vmem:[%s3784_s4 + $0x40] sm:$0xf]  ;;  %v4084_v45 = vld [vmem:[%s3784_s4 + $0x44] sm:$0x1] }
  0x53   : > { %v360_v15 = vsel %vm3823_vm4, %v355_v40, %v359_v13  ;;  %3275 = vmatpush3.bf16.msra.mxu0 %v3835_v41  ;;  %v378_v52 = vor.u32 %v377_v47, %v373_v46  ;;  %v386_v61 = vshrl.u32 %v4035_v28, 16  ;;  %v389_v59 = vshll.u32 %v4035_v28, 16 }
  0x54   : > { %v2807_v63 = vcombine.low %v350_v33, %v360_v15  ;;  %v369_v0 = vrot.slane %v368_v51, 4  ;;  %v1610_v2 = vsel %vm3978_vm7, %v1608_v53, %v1609_v49  ;;  %v395_v26 = vshll.u32 %v4051_v37, 16  ;;  %3466 = vmatprep.subr.msk.bf16.mxu0 %vm460_vm0, %v4046_v34  ;;  %v2939_v33 = vld [vmem:[%s3784_s4 + $0x3c] sm:$0xe] }
  0x55   : > { %v399_v9 = vshrl.u32 %v4051_v37, 16  ;;  %v379_v41 = vrot.slane %v378_v52, 4  ;;  %v2954_v13 = vcombine.low %v1607_v16, %v1610_v2  ;;  %v388_v17 = vrot.slane %v386_v61, 4  ;;  %v2940_v2 = vld [vmem:[%s3784_s4 + $0x48] sm:$0xe] }
  0x56   : > { %3177 = vmatmul.mubr.msk.bf16.gmra.mrb[8].mxu1 %vm435_vm3, %v2807_v63  ;;  %v391_v12 = vrot.slane %v389_v59, 5  ;;  %v374_v20 = vsel %vm3823_vm4, %v369_v0, %v373_v46  ;;  %v397_v22 = vrot.slane %v395_v26, 5  ;;  %v405_v1 = vshll.u32 %v4060_v54, 16  ;;  %v4099_v59 = vld [vmem:[%s3784_s4 + $0x4c] sm:$0xf] }
  0x57   : > { %v401_v24 = vrot.slane %v399_v9, 4  ;;  %v384_v35 = vsel %vm3823_vm4, %v379_v41, %v383_v48  ;;  %3262 = vmatprep.mubr.msk.bf16.mxu0 %vm435_vm3, %v2954_v13  ;;  %v2946_v25 = vrot.slane %v2938_v10, 9  ;;  %v1613_v40 = vrot.slane %v3934_v50, 5  ;;  %v4102_v0 = vld [vmem:[%s3784_s4 + $0x50] sm:$0x1] }
  0x58   : > { %v392_v60 = vor.u32 %v391_v12, %v388_v17  ;;  %v2808_v43 = vcombine.low %v374_v20, %v384_v35  ;;  %v407_v47 = vrot.slane %v405_v1, 5  ;;  %v1616_v49 = vrot.slane %v3944_v58, 5  ;;  %v4110_v17 = vld [vmem:[%s3784_s4 + $0x58] sm:$0xf]  ;;  %v4113_v12 = vld [vmem:[%s3784_s4 + $0x5c] sm:$0x1] }
  0x59   : > { %v402_v46 = vor.u32 %v401_v24, %v397_v22  ;;  %v1614_v48 = vsel %vm3978_vm7, %v2946_v25, %v1613_v40  ;;  %v1615_v51 = vrot.slane %v1613_v40, 4  ;;  %v2947_v16 = vrot.slane %v2939_v33, 9  ;;  %4741 = vst [vmem:[#allocation5_spill] sm:$0xff] %v4113_v12  ;;  %v4123_v35 = vld [vmem:[%s3784_s4 + $0x64] sm:$0xf] }
  0x5a   : > { %v393_v15 = vrot.slane %v392_v60, 4  ;;  %3180 = vmatprep.mubr.msk.bf16.mxu1 %vm435_vm3, %v2808_v43  ;;  %v1620_v53 = vrot.slane %v4081_v42, 5  ;;  %v1623_v63 = vrot.slane %v4084_v45, 5  ;;  %v2818_v61 = vcombine.low %v3787_v6, %v3790_v7  ;;  %v2941_v6 = vld [vmem:[%s3784_s4 + $0x54] sm:$0xe]  ;;  %4742 = vst [vmem:[#allocation6_spill] sm:$0xff] %v4123_v35 }
  0x5b   : > { %v403_v50 = vrot.slane %v402_v46, 4  ;;  %v1617_v58 = vsel %vm3978_vm7, %v1615_v51, %v1616_v49  ;;  %v1627_v24 = vrot.slane %v4099_v59, 5  ;;  %v1630_v1 = vrot.slane %v4102_v0, 5  ;;  %v4126_v60 = vld [vmem:[%s3784_s4 + $0x68] sm:$0x1] }
  0x5c   : > { %v398_v52 = vsel %vm3823_vm4, %v393_v15, %v397_v22  ;;  %v2955_v9 = vcombine.low %v1614_v48, %v1617_v58  ;;  %v1621_v10 = vsel %vm3978_vm7, %v2947_v16, %v1620_v53  ;;  %v1622_v41 = vrot.slane %v1620_v53, 4  ;;  %4743 = vst [vmem:[#allocation7_spill] sm:$0xff] %v4126_v60 }
  0x5d   : > { %v408_v26 = vsel %vm3823_vm4, %v403_v50, %v407_v47  ;;  %v2948_v22 = vrot.slane %v2940_v2, 9  ;;  %v1629_v40 = vrot.slane %v1627_v24, 4  ;;  %v2949_v43 = vrot.slane %v2941_v6, 9  ;;  %v2942_v47 = vld [vmem:[%s3784_s4 + $0x60] sm:$0xe] }
  0x5e   : > { %v2809_v13 = vcombine.low %v398_v52, %v408_v26  ;;  %3263 = vmatmul.mubr.msk.bf16.gmra.mrb[4].mxu0 %vm435_vm3, %v2955_v9  ;;  %v1624_v20 = vsel %vm3978_vm7, %v1622_v41, %v1623_v63  ;;  %v1634_v46 = vrot.slane %v4110_v17, 5  ;;  %v761_v49 = vrot.slane %v3828_v36, 5  ;;  %v727_v2 = vld [vmem:[%s3784_s4 + $0x18] sm:$0xe]  ;;  %v4158_v6 = vld [vmem:[%s4727_s1 + $0x6] sm:$0x3] }
  0x5f   : > { %v2956_v33 = vcombine.low %v1621_v10, %v1624_v20  ;;  %v1628_v25 = vsel %vm3978_vm7, %v2948_v22, %v1627_v24  ;;  %v1637_v15 = vrot.slane %v4113_v12, 5  ;;  %v1631_v48 = vsel %vm3978_vm7, %v1629_v40, %v1630_v1  ;;  %v729_v1 = vld [vmem:[%s3784_s4 + $0x30] sm:$0xe] }
  0x60   : > { %3181 = vmatmul.mubr.msk.bf16.gmra.mrb[12].mxu1 %vm435_vm3, %v2809_v13  ;;  %v1635_v51 = vsel %vm3978_vm7, %v2949_v43, %v1634_v46  ;;  %v1636_v16 = vrot.slane %v1634_v46, 4  ;;  %v1641_v50 = vrot.slane %v4123_v35, 5  ;;  %v2819_v53 = vcombine.low %v3819_v31, %v3828_v36  ;;  %v728_v36 = vld [vmem:[%s3784_s4 + $0x24] sm:$0xe]  ;;  %v4432_v12 = vld [vmem:[%s3784_s4 + $0x70] sm:$0xf] }
  0x61   : > { %3186 = vmatprep.mubr.msk.bf16.mxu1 %vm435_vm3, %v2818_v61  ;;  %3266 = vmatprep.mubr.msk.bf16.mxu0 %vm435_vm3, %v2956_v33  ;;  %v2957_v63 = vcombine.low %v1628_v25, %v1631_v48  ;;  %v2950_v52 = vrot.slane %v2942_v47, 9  ;;  %v1644_v58 = vrot.slane %v4126_v60, 5  ;;  %v726_v61 = vld [vmem:[%s3784_s4 + $0xc] sm:$0xe]  ;;  %v764_v26 = vrot.slane %v3838_v44, 5 }
  0x62   : > { %v2820_v9 = vcombine.low %v3867_v21, %v3874_v27  ;;  %v1638_v10 = vsel %vm3978_vm7, %v1636_v16, %v1637_v15  ;;  %v1643_v41 = vrot.slane %v1641_v50, 4  ;;  %v859_v13 = vsel %vm460_vm0, %v3898_v57, 0  ;;  %v3547_v16 = vld [vmem:[%s3784_s4 + $0x18] sm:$0xff]   ;;  %v4404_v60 = vld [vmem:[%s3784_s4 + $0x64] sm:$0xf] }
  0x63   : > { %v2958_v31 = vcombine.low %v1635_v51, %v1638_v10  ;;  %v2835_v44 = vrot.slane %v726_v61, 9  ;;  %v763_v20 = vrot.slane %v761_v49, 4  ;;  %v2836_v21 = vrot.slane %v727_v2, 9  ;;  %4744 = vst [vmem:[#allocation8_spill] sm:$0xff] %v4404_v60 }
  0x64   : > { %v1642_v22 = vsel %vm3978_vm7, %v2950_v52, %v1641_v50  ;;  %v1645_v57 = vsel %vm3978_vm7, %v1643_v41, %v1644_v58  ;;  %v768_v24 = vrot.slane %v3874_v27, 5  ;;  %v771_v40 = vrot.slane %v3882_v38, 5 }
  0x65   : > { %v4171_v33 = vsel %vm3978_vm7, %v2835_v44, %v761_v49  ;;  %v4175_v25 = vsel %vm3978_vm7, %v763_v20, %v764_v26  ;;  %v2837_v43 = vrot.slane %v728_v36, 9  ;;  %v2959_v49 = vcombine.low %v1642_v22, %v1645_v57  ;;  %v3003_v26 = vld [vmem:[%s3784_s4 + $0x18] sm:$0xf]  ;;  %v3549_v57 = vld [vmem:[%s3784_s4 + $0x24] sm:$0xff]  }
  0x66   : > { %3267 = vmatmul.mubr.msk.bf16.gmra.mrb[8].mxu0 %vm435_vm3, %v2957_v63  ;;  %v2844_v27 = vcombine.low %v4171_v33, %v4175_v25  ;;  %v4184_v46 = vsel %vm3978_vm7, %v2836_v21, %v768_v24  ;;  %v770_v47 = vrot.slane %v768_v24, 4  ;;  %v775_v15 = vrot.slane %v3914_v19, 5 }
  0x67   : > { %3270 = vmatprep.mubr.msk.bf16.mxu0 %vm435_vm3, %v2958_v31  ;;  %v778_v48 = vrot.slane %v3924_v29, 5  ;;  %v2838_v38 = vrot.slane %v729_v1, 9  ;;  %v2821_v51 = vcombine.low %v3911_v11, %v3914_v19  ;;  %v785_v63 = vrot.slane %v3960_v39, 5  ;;  %v730_v19 = vld [vmem:[%s3784_s4 + $0x3c] sm:$0xe] }
  0x68   : > { %3187 = vmatmul.mubr.msk.bf16.vlgmr.msra.gmra.mrb[0].mxu1 %vm435_vm3, %v2819_v53  ;;  %v4193_v50 = vsel %vm3978_vm7, %v770_v47, %v771_v40  ;;  %v782_v53 = vrot.slane %v3955_v23, 5  ;;  %v2822_v52 = vcombine.low %v3949_v14, %v3955_v23  ;;  %v4203_v58 = vsel %vm3978_vm7, %v2837_v43, %v775_v15  ;;  %v725_v14 = vld [vmem:[%s3784_s4] sm:$0xe]  ;;  %v4231_v31 = vld [vmem:[%s3784_s4 + $0x1c] sm:$0xf] }
  0x69   : > { %3203 = vmatpush3.bf16.msra.mxu1 %v859_v13  ;;  %3190 = vmatprep.mubr.msk.bf16.mxu1 %vm435_vm3, %v2820_v9  ;;  %v2845_v29 = vcombine.low %v4184_v46, %v4193_v50  ;;  %v777_v11 = vrot.slane %v775_v15, 4  ;;  %v754_v61 = vrot.slane %v3790_v7, 5  ;;  %v2839_v10 = vrot.slane %v730_v19, 9  ;;  %v731_v1 = vld [vmem:[%s3784_s4 + $0x48] sm:$0xe] }
  0x6a   : > { %3461 = vmatprep.subr.msk.bf16.mxu1 %vm460_vm0, %v4158_v6  ;;  %v4209_v2 = vsel %vm3978_vm7, %v2838_v38, %v782_v53  ;;  %v784_v39 = vrot.slane %v782_v53, 4  ;;  %v757_v41 = vrot.slane %v3793_v8, 5  ;;  %v2834_v36 = vrot.slane %v725_v14, 9  ;;  %v4257_v38 = vld [vmem:[%s4727_s1 + $0x10] sm:$0x3] }
  0x6b   : > { %v4215_v23 = vsel %vm3978_vm7, %v777_v11, %v778_v48  ;;  %v756_v44 = vrot.slane %v754_v61, 4  ;;  %v789_v20 = vrot.slane %v3983_v4, 5  ;;  %v792_v21 = vrot.slane %v3986_v18, 5  ;;  %v4278_v14 = vld [vmem:[%s3784_s4 + $0x28] sm:$0xf] }
  0x6c   : > { %v4224_v9 = vsel %vm3978_vm7, %v784_v39, %v785_v63  ;;  %v2823_v22 = vcombine.low %v3972_v56, %v3983_v4  ;;  %v2039_v24 = vshrl.u32 %v3003_v26, 16  ;;  %v2042_v8 = vshll.u32 %v3003_v26, 16  ;;  %v3551_v4 = vld [vmem:[%s3784_s4 + $0x30] sm:$0xff]   ;;  %v4380_v46 = vld [vmem:[%s3784_s4 + $0x44] sm:$0x1] }
  0x6d   : > { %v2048_v40 = vshll.u32 %v4231_v31, 16  ;;  %v2052_v43 = vshrl.u32 %v4231_v31, 16  ;;  %v4243_v47 = vsel %vm3978_vm7, %v2839_v10, %v789_v20  ;;  %v2281_v18 = vsel %vm460_vm0, %v4046_v34, 0  ;;  %v3021_v7 = vld [vmem:[%s3784_s4 + $0x60] sm:$0xf] }
  0x6e   : > { %3271 = vmatmul.mubr.msk.bf16.gmra.mrb[12].mxu0 %vm435_vm3, %v2959_v49  ;;  %v791_v49 = vrot.slane %v789_v20, 4  ;;  %v2824_v56 = vcombine.low %v3997_v30, %v4013_v62  ;;  %v755_v15 = vsel %vm3978_vm7, %v2834_v36, %v754_v61  ;;  %v758_v48 = vsel %vm3978_vm7, %v756_v44, %v757_v41  ;;  %v4265_v30 = vld [vmem:[%s3784_s4 + $0x20] sm:$0x1]  ;;  %v3006_v61 = vld [vmem:[%s3784_s4 + $0x24] sm:$0xf] }
  0x6f   : > { %3276 = vmatprep.mubr.msk.bf16.mxu0 %vm435_vm3, %v3547_v16  ;;  %v2840_v34 = vrot.slane %v731_v1, 9  ;;  %v2041_v16 = vrot.slane %v2039_v24, 4  ;;  %v2044_v53 = vrot.slane %v2042_v8, 5  ;;  %v4271_v11 = vrot.slane %v2048_v40, 5  ;;  %v732_v44 = vld [vmem:[%s3784_s4 + $0x54] sm:$0xe] }
  0x70   : > { %3191 = vmatmul.mubr.msk.bf16.gmra.mrb[4].mxu1 %vm435_vm3, %v2821_v51  ;;  %v4261_v51 = vsel %vm3978_vm7, %v791_v49, %v792_v21  ;;  %v2054_v19 = vrot.slane %v2052_v43, 4  ;;  %v799_v39 = vrot.slane %v4017_v55, 5  ;;  %v2825_v10 = vcombine.low %v4035_v28, %v4051_v37  ;;  %v3009_v55 = vld [vmem:[%s3784_s4 + $0x30] sm:$0xf]  ;;  %v3553_v20 = vld [vmem:[%s3784_s4 + $0x3c] sm:$0xff]   ;;  %v3554_v1 = vld [vmem:[%s3784_s4 + $0x48] sm:$0xff]  }
  0x71   : > { %3194 = vmatprep.mubr.msk.bf16.mxu1 %vm435_vm3, %v2822_v52  ;;  %v796_v52 = vrot.slane %v4013_v62, 5  ;;  %v2843_v41 = vcombine.low %v755_v15, %v758_v48  ;;  %v2058_v36 = vshll.u32 %v4265_v30, 16  ;;  %v2045_v21 = vor.u32 %v2044_v53, %v2041_v16  ;;  %v4297_v8 = vld [vmem:[%s3784_s4 + $0x34] sm:$0xf] }
  0x72   : > { %v2055_v28 = vor.u32 %v2054_v19, %v4271_v11  ;;  %v2072_v40 = vshll.u32 %v4278_v14, 16  ;;  %v2076_v43 = vshrl.u32 %v4278_v14, 16  ;;  %v803_v15 = vrot.slane %v4051_v37, 5 }
  0x73   : > { %v4282_v62 = vsel %vm3978_vm7, %v2840_v34, %v796_v52  ;;  %v798_v26 = vrot.slane %v796_v52, 4  ;;  %v2096_v48 = vshll.u32 %v4297_v8, 16  ;;  %v2100_v34 = vshrl.u32 %v4297_v8, 16 }
  0x74   : > { %v806_v16 = vrot.slane %v4060_v54, 5  ;;  %v2046_v53 = vrot.slane %v2045_v21, 4  ;;  %v2060_v52 = vrot.slane %v2058_v36, 5  ;;  %v2056_v37 = vrot.slane %v2055_v28, 4  ;;  %v4320_v36 = vld [vmem:[%s3784_s4 + $0x2c] sm:$0x1] }
  0x75   : > { %v4294_v24 = vsel %vm3978_vm7, %v798_v26, %v799_v39  ;;  %v4316_v26 = vrot.slane %v2072_v40, 5  ;;  %v4327_v21 = vld [vmem:[%s3784_s4 + $0x38] sm:$0x1]  ;;  %v1061_v28 = vsel %vm460_vm0, %v4158_v6, 0 }
  0x76   : > { %3277 = vmatmul.mubr.msk.bf16.vlgmr.msra.gmra.mrb[0].mxu0 %vm435_vm3, %v3549_v57  ;;  %v2066_v57 = vshll.u32 %v3006_v61, 16  ;;  %v3555_v40 = vld [vmem:[%s3784_s4 + $0x54] sm:$0xff]  }
  0x77   : > { %3293 = vmatpush3.bf16.msra.mxu0 %v2281_v18  ;;  %3280 = vmatprep.mubr.msk.bf16.mxu0 %vm435_vm3, %v3551_v4  ;;  %v2087_v18 = vshrl.u32 %v3009_v55, 16  ;;  %v2841_v4 = vrot.slane %v732_v44, 9 }
  0x78   : > { %3195 = vmatmul.mubr.msk.bf16.gmra.mrb[8].mxu1 %vm435_vm3, %v2823_v22  ;;  %3467 = vmatprep.subr.msk.bf16.mxu0 %vm460_vm0, %v4257_v38  ;;  %v2063_v22 = vshrl.u32 %v3006_v61, 16  ;;  %v805_v61 = vrot.slane %v803_v15, 4  ;;  %v2068_v54 = vrot.slane %v2066_v57, 5  ;;  %v2102_v57 = vrot.slane %v2100_v34, 4  ;;  %v3015_v34 = vld [vmem:[%s3784_s4 + $0x48] sm:$0xf] }
  0x79   : > { %3198 = vmatprep.mubr.msk.bf16.mxu1 %vm435_vm3, %v2824_v56  ;;  %v2090_v56 = vshll.u32 %v3009_v55, 16  ;;  %v4312_v19 = vsel %vm3978_vm7, %v2841_v4, %v803_v15  ;;  %v2078_v55 = vrot.slane %v2076_v43, 4  ;;  %v2089_v44 = vrot.slane %v2087_v18, 4  ;;  %v4338_v43 = vld [vmem:[%s3784_s4 + $0x40] sm:$0xf] }
  0x7a   : > { %v2065_v39 = vrot.slane %v2063_v22, 4  ;;  %v4329_v22 = vrot.slane %v2096_v48, 5  ;;  %v3556_v18 = vld [vmem:[%s3784_s4 + $0x60] sm:$0xff]   ;;  %v2061_v4 = vsel %vm3823_vm4, %v2056_v37, %v2060_v52  ;;  %v2082_v48 = vshll.u32 %v4320_v36, 16 }
  0x7b   : > { %v2135_v52 = vshrl.u32 %v3015_v34, 16  ;;  %v2138_v37 = vshll.u32 %v3015_v34, 16 }
  0x7c   : > { %v2069_v15 = vor.u32 %v2068_v54, %v2065_v39  ;;  %v2103_v63 = vor.u32 %v2102_v57, %v4329_v22  ;;  %v3018_v57 = vld [vmem:[%s3784_s4 + $0x54] sm:$0xf] }
  0x7d   : > { %v2137_v50 = vrot.slane %v2135_v52, 4  ;;  %v2162_v34 = vshll.u32 %v3018_v57, 16 }
  0x7e   : > { %3281 = vmatmul.mubr.msk.bf16.gmra.mrb[4].mxu0 %vm435_vm3, %v3553_v20  ;;  %v2092_v20 = vrot.slane %v2090_v56, 5  ;;  %v2051_v56 = vsel %vm3823_vm4, %v2046_v53, %v4271_v11  ;;  %v2120_v11 = vshll.u32 %v4338_v43, 16  ;;  %v2124_v53 = vshrl.u32 %v4338_v43, 16 }
  0x7f   : > { %3284 = vmatprep.mubr.msk.bf16.mxu0 %vm435_vm3, %v3554_v1  ;;  %v2106_v1 = vshll.u32 %v4327_v21, 16  ;;  %v3028_v54 = vcombine.low %v2051_v56, %v2061_v4  ;;  %v2104_v56 = vrot.slane %v2103_v63, 4  ;;  %v4385_v63 = vld [vmem:[%s3784_s4 + $0x50] sm:$0x1] }
  0x80   : > { %3199 = vmatmul.mubr.msk.bf16.gmra.mrb[12].mxu1 %vm435_vm3, %v2825_v10  ;;  %v4324_v10 = vsel %vm3978_vm7, %v805_v61, %v806_v16  ;;  %v4349_v16 = vld [vmem:[%s3784_s4 + $0x4c] sm:$0xf]  ;;  %v2079_v61 = vor.u32 %v2078_v55, %v4316_v26  ;;  %v2093_v6 = vor.u32 %v2092_v20, %v2089_v44  ;;  %v2070_v55 = vrot.slane %v2069_v15, 4 }
  0x81   : > { %3204 = vmatprep.mubr.msk.bf16.mxu1 %vm435_vm3, %v2843_v41  ;;  %v3012_v41 = vld [vmem:[%s3784_s4 + $0x3c] sm:$0xf]  ;;  %v2144_v39 = vshll.u32 %v4349_v16, 16  ;;  %v2084_v44 = vrot.slane %v2082_v48, 5  ;;  %v2148_v20 = vshrl.u32 %v4349_v16, 16  ;;  %v2108_v33 = vrot.slane %v2106_v1, 5 }
  0x82   : > { %v2111_v49 = vshrl.u32 %v3012_v41, 16  ;;  %v2114_v13 = vshll.u32 %v3012_v41, 16  ;;  %v2080_v41 = vrot.slane %v2079_v61, 4  ;;  %v4373_v15 = vrot.slane %v2120_v11, 5 }
  0x83   : > { %v2126_v48 = vrot.slane %v2124_v53, 4  ;;  %v2159_v1 = vshrl.u32 %v3018_v57, 16  ;;  %v1330_v11 = vshll.u32 %v4099_v59, 16  ;;  %v2075_v53 = vsel %vm3823_vm4, %v2070_v55, %v4316_v26 }
  0x84   : > { %v2113_v25 = vrot.slane %v2111_v49, 4  ;;  %v2116_v4 = vrot.slane %v2114_v13, 5  ;;  %v4382_v49 = vrot.slane %v2144_v39, 5  ;;  %v2150_v13 = vrot.slane %v2148_v20, 4 }
  0x85   : > { %v2085_v52 = vsel %vm3823_vm4, %v2080_v41, %v2084_v44  ;;  %v2127_v57 = vor.u32 %v2126_v48, %v4373_v15  ;;  %v2109_v26 = vsel %vm3823_vm4, %v2104_v56, %v2108_v33  ;;  %v2161_v44 = vrot.slane %v2159_v1, 4  ;;  %v4423_v56 = vld [vmem:[%s3784_s4 + $0x5c] sm:$0x1] }
  0x86   : > { %3285 = vmatmul.mubr.msk.bf16.gmra.mrb[8].mxu0 %vm435_vm3, %v3555_v40  ;;  %v2094_v40 = vrot.slane %v2093_v6, 4  ;;  %v2117_v20 = vor.u32 %v2116_v4, %v2113_v25  ;;  %v2151_v41 = vor.u32 %v2150_v13, %v4382_v49  ;;  %v4746_v33 = vcombine.low %v4209_v2, %v4224_v9 }
  0x87   : > { %3288 = vmatprep.mubr.msk.bf16.mxu0 %vm435_vm3, %v3556_v18  ;;  %v3557_v18 = vld [vmem:[%s3784_s4 + $0x6c] sm:$0xff]   ;;  %v2183_v4 = vshrl.u32 %v3021_v7, 16  ;;  %v1334_v48 = vshrl.u32 %v4099_v59, 16  ;;  %v3029_v13 = vcombine.low %v2075_v53, %v2085_v52 }
  0x88   : > { %3205 = vmatmul.mubr.msk.bf16.vlgmr.msra.gmra.mrb[0].mxu1 %vm435_vm3, %v2844_v27  ;;  %v4370_v27 = vld [vmem:[%s3784_s4 + $0x58] sm:$0xf]  ;;  %v2099_v39 = vsel %vm3823_vm4, %v2094_v40, %v4329_v22  ;;  %v4745_v22 = vcombine.low %v4203_v58, %v4215_v23  ;;  %v2164_v40 = vrot.slane %v2162_v34, 5  ;;  %v2186_v58 = vshll.u32 %v3021_v7, 16 }
  0x89   : > { %3221 = vmatpush3.bf16.msra.mxu1 %v1061_v28  ;;  %3208 = vmatprep.mubr.msk.bf16.mxu1 %vm435_vm3, %v2845_v29  ;;  %v3566_v28 = vld [vmem:[%s4727_s1 + $0x8] sm:$0x3]  ;;  %v2140_v29 = vrot.slane %v2138_v37, 5  ;;  %v2168_v61 = vshll.u32 %v4370_v27, 16  ;;  %v2172_v6 = vshrl.u32 %v4370_v27, 16  ;;  %v2535_v37 = vsel %vm460_vm0, %v4257_v38, 0 }
  0x8a   : > { %3463 = vmatprep.subr.msk.bf16.mxu1 %vm460_vm0, %v3566_v28  ;;  %v2130_v28 = vshll.u32 %v4380_v46, 16  ;;  %v2154_v38 = vshll.u32 %v4385_v63, 16  ;;  %v2192_v23 = vshll.u32 %v4404_v60, 16  ;;  %v3030_v34 = vcombine.low %v2099_v39, %v2109_v26 }
  0x8b   : > { %v2141_v55 = vor.u32 %v2140_v29, %v2137_v50  ;;  %v4416_v25 = vrot.slane %v2168_v61, 5  ;;  %v2118_v50 = vrot.slane %v2117_v20, 4  ;;  %v2128_v29 = vrot.slane %v2127_v57, 4 }
  0x8c   : > { %v2132_v1 = vrot.slane %v2130_v28, 5  ;;  %v2156_v9 = vrot.slane %v2154_v38, 5  ;;  %v2152_v61 = vrot.slane %v2151_v41, 4  ;;  %v2178_v7 = vshll.u32 %v4423_v56, 16  ;;  %v4444_v28 = vld [vmem:[%s3784_s4 + $0x68] sm:$0x1] }
  0x8d   : > { %v2142_v2 = vrot.slane %v2141_v55, 4  ;;  %v2185_v35 = vrot.slane %v2183_v4, 4  ;;  %v4434_v59 = vrot.slane %v2192_v23, 5  ;;  %v4436_v57 = vrot.slane %v1330_v11, 5 }
  0x8e   : > { %3289 = vmatmul.mubr.msk.bf16.gmra.mrb[12].mxu0 %vm435_vm3, %v3557_v18  ;;  %v2174_v18 = vrot.slane %v2172_v6, 4  ;;  %v2165_v6 = vor.u32 %v2164_v40, %v2161_v44  ;;  %v1336_v53 = vrot.slane %v1334_v48, 4  ;;  %v2123_v52 = vsel %vm3823_vm4, %v2118_v50, %v4373_v15 }
  0x8f   : > { %3294 = vmatprep.mubr.msk.bf16.mxu0 %vm435_vm3, %v3028_v54  ;;  %v2196_v54 = vshrl.u32 %v4404_v60, 16  ;;  %v2188_v60 = vrot.slane %v2186_v58, 5  ;;  %v2133_v39 = vsel %vm3823_vm4, %v2128_v29, %v2132_v1  ;;  %v2216_v38 = vshll.u32 %v4432_v12, 16  ;;  %v3558_v1 = vld [vmem:[%s3784_s4 + $0xc] sm:$0xff]  }
  0x90   : > { %3209 = vmatmul.mubr.msk.bf16.gmra.mrb[4].mxu1 %vm435_vm3, %v4745_v22  ;;  %v2175_v22 = vor.u32 %v2174_v18, %v4416_v25  ;;  %v2220_v44 = vshrl.u32 %v4432_v12, 16  ;;  %v4747_v11 = vcombine.low %v4243_v47, %v4261_v51  ;;  %v2147_v15 = vsel %vm3823_vm4, %v2142_v2, %v4382_v49 }
  0x91   : > { %3212 = vmatprep.mubr.msk.bf16.mxu1 %vm435_vm3, %v4746_v33  ;;  %v3024_v33 = vld [vmem:[%s3784_s4 + $0x6c] sm:$0xf]  ;;  %v2198_v20 = vrot.slane %v2196_v54, 4  ;;  %v2157_v41 = vsel %vm3823_vm4, %v2152_v61, %v2156_v9  ;;  %v2166_v40 = vrot.slane %v2165_v6, 4  ;;  %v2180_v18 = vrot.slane %v2178_v7, 5 }
  0x92   : > { %v2207_v26 = vshrl.u32 %v3024_v33, 16  ;;  %v2210_v55 = vshll.u32 %v3024_v33, 16  ;;  %v4748_v4 = vcombine.low %v4282_v62, %v4294_v24  ;;  %v2176_v47 = vrot.slane %v2175_v22, 4  ;;  %v2909_v22 = vld [vmem:[%s3784_s4 + $0x48] sm:$0xf] }
  0x93   : > { %v2189_v51 = vor.u32 %v2188_v60, %v2185_v35  ;;  %v2202_v49 = vshll.u32 %v4444_v28, 16  ;;  %v1337_v58 = vor.u32 %v1336_v53, %v4436_v57  ;;  %v1340_v23 = vshll.u32 %v4102_v0, 16  ;;  %v4473_v60 = vld [vmem:[%s3784_s4 + $0x74] sm:$0x1] }
  0x94   : > { %v3031_v54 = vcombine.low %v2123_v52, %v2133_v39  ;;  %v2209_v48 = vrot.slane %v2207_v26, 4  ;;  %v2212_v62 = vrot.slane %v2210_v55, 5  ;;  %v4467_v24 = vrot.slane %v2216_v38, 5 }
  0x95   : > { %v2222_v50 = vrot.slane %v2220_v44, 4  ;;  %v3032_v29 = vcombine.low %v2147_v15, %v2157_v41  ;;  %v2171_v35 = vsel %vm3823_vm4, %v2166_v40, %v4416_v25  ;;  %v2190_v0 = vrot.slane %v2189_v51, 4  ;;  %v3560_v51 = vld [vmem:[%s3784_s4 + $0x24] sm:$0xff]  }
  0x96   : > { %3295 = vmatmul.mubr.msk.bf16.vlgmr.msra.gmra.mrb[0].mxu0 %vm435_vm3, %v3029_v13  ;;  %v2181_v13 = vsel %vm3823_vm4, %v2176_v47, %v2180_v18  ;;  %v2204_v2 = vrot.slane %v2202_v49, 5  ;;  %v1338_v9 = vrot.slane %v1337_v58, 4  ;;  %v1342_v61 = vrot.slane %v1340_v23, 5 }
  0x97   : > { %3311 = vmatpush3.bf16.msra.mxu0 %v2535_v37  ;;  %3298 = vmatprep.mubr.msk.bf16.mxu0 %vm435_vm3, %v3030_v34  ;;  %v2199_v37 = vor.u32 %v2198_v20, %v4434_v59  ;;  %v2430_v6 = vrot.slane %v4231_v31, 5  ;;  %v2213_v7 = vor.u32 %v2212_v62, %v2209_v48  ;;  %v2223_v33 = vor.u32 %v2222_v50, %v4467_v24  ;;  %v3044_v20 = vld [vmem:[%s3784_s4 + $0x18] sm:$0xe]  ;;  %v3046_v62 = vld [vmem:[%s3784_s4 + $0x30] sm:$0xe] }
  0x98   : > { %3213 = vmatmul.mubr.msk.bf16.gmra.mrb[8].mxu1 %vm435_vm3, %v4747_v11  ;;  %v2226_v25 = vshll.u32 %v4473_v60, 16  ;;  %v4749_v53 = vcombine.low %v4312_v19, %v4324_v10  ;;  %v3033_v52 = vcombine.low %v2171_v35, %v2181_v13  ;;  %v2195_v31 = vsel %vm3823_vm4, %v2190_v0, %v4434_v59  ;;  %v3559_v59 = vld [vmem:[%s3784_s4 + $0x18] sm:$0xff]  }
  0x99   : > { %3216 = vmatprep.mubr.msk.bf16.mxu1 %vm435_vm3, %v4748_v4  ;;  %v2200_v34 = vrot.slane %v2199_v37, 4  ;;  %v1321_v26 = vshrl.u32 %v2909_v22, 16  ;;  %v1324_v55 = vshll.u32 %v2909_v22, 16  ;;  %v3052_v19 = vrot.slane %v3044_v20, 9  ;;  %v2906_v4 = vld [vmem:[%s3784_s4 + $0x3c] sm:$0xf] }
  0x9a   : > { %v2432_v10 = vrot.slane %v2430_v6, 4  ;;  %v2433_v38 = vrot.slane %v4265_v30, 5  ;;  %v1343_v44 = vsel %vm3823_vm4, %v1338_v9, %v1342_v61  ;;  %v2214_v11 = vrot.slane %v2213_v7, 4  ;;  %v3045_v30 = vld [vmem:[%s3784_s4 + $0x24] sm:$0xe]  ;;  %v3561_v22 = vld [vmem:[%s3784_s4 + $0x30] sm:$0xff]  }
  0x9b   : > { %v2205_v39 = vsel %vm3823_vm4, %v2200_v34, %v2204_v2  ;;  %v2224_v15 = vrot.slane %v2223_v33, 4  ;;  %v2228_v41 = vrot.slane %v2226_v25, 5  ;;  %v1323_v40 = vrot.slane %v1321_v26, 4  ;;  %v3562_v20 = vld [vmem:[%s3784_s4 + $0x3c] sm:$0xff]   ;;  %v2912_v26 = vld [vmem:[%s3784_s4 + $0x54] sm:$0xf] }
  0x9c   : > { %v3034_v18 = vcombine.low %v2195_v31, %v2205_v39  ;;  %v1326_v47 = vrot.slane %v1324_v55, 5  ;;  %v2431_v37 = vsel %vm3978_vm7, %v3052_v19, %v2430_v6  ;;  %v2434_v49 = vsel %vm3978_vm7, %v2432_v10, %v2433_v38  ;;  %v3048_v38 = vld [vmem:[%s3784_s4 + $0x48] sm:$0xe] }
  0x9d   : > { %v2437_v58 = vrot.slane %v4278_v14, 5  ;;  %v2229_v48 = vsel %vm3823_vm4, %v2224_v15, %v2228_v41  ;;  %v2444_v50 = vrot.slane %v4297_v8, 5  ;;  %v1300_v35 = vshll.u32 %v2906_v4, 16 }
  0x9e   : > { %3299 = vmatmul.mubr.msk.bf16.gmra.mrb[4].mxu0 %vm435_vm3, %v3031_v54  ;;  %v1327_v23 = vor.u32 %v1326_v47, %v1323_v40  ;;  %v2219_v54 = vsel %vm3823_vm4, %v2214_v11, %v4467_v24  ;;  %v1306_v14 = vshll.u32 %v4081_v42, 16  ;;  %v3053_v24 = vrot.slane %v3045_v30, 9 }
  0x9f   : > { %3302 = vmatprep.mubr.msk.bf16.mxu0 %vm435_vm3, %v3032_v29  ;;  %v1297_v29 = vshrl.u32 %v2906_v4, 16  ;;  %v2440_v8 = vrot.slane %v4320_v36, 5  ;;  %v3061_v0 = vcombine.low %v2431_v37, %v2434_v49  ;;  %v2439_v34 = vrot.slane %v2437_v58, 4  ;;  %v3563_v37 = vld [vmem:[%s3784_s4 + $0x48] sm:$0xff]  }
  0xa0   : > { %3217 = vmatmul.mubr.msk.bf16.gmra.mrb[12].mxu1 %vm435_vm3, %v4749_v53  ;;  %v1328_v13 = vrot.slane %v1327_v23, 4  ;;  %v3054_v2 = vrot.slane %v3046_v62, 9  ;;  %v3035_v61 = vcombine.low %v2219_v54, %v2229_v48  ;;  %v2446_v6 = vrot.slane %v2444_v50, 4  ;;  %v3564_v23 = vld [vmem:[%s3784_s4 + $0x54] sm:$0xff]  }
  0xa1   : > { %3222 = vmatprep.mubr.msk.bf16.mxu1 %vm435_vm3, %v3558_v1  ;;  %v1310_v1 = vshrl.u32 %v4081_v42, 16  ;;  %v2447_v42 = vrot.slane %v4327_v21, 5  ;;  %v1299_v7 = vrot.slane %v1297_v29, 4  ;;  %v1302_v33 = vrot.slane %v1300_v35, 5 }
  0xa2   : > { %v1333_v9 = vsel %vm3823_vm4, %v1328_v13, %v4436_v57  ;;  %v4529_v25 = vrot.slane %v1306_v14, 5  ;;  %v2438_v53 = vsel %vm3978_vm7, %v3053_v24, %v2437_v58  ;;  %v2441_v57 = vsel %vm3978_vm7, %v2439_v34, %v2440_v8  ;;  %v3049_v24 = vld [vmem:[%s3784_s4 + $0x54] sm:$0xe]  ;;  %v4750_v8 = vld [vmem:[#allocation8_spill] sm:$0xff] }
  0xa3   : > { %v1312_v36 = vrot.slane %v1310_v1, 4  ;;  %v2445_v21 = vsel %vm3978_vm7, %v3054_v2, %v2444_v50  ;;  %v2451_v31 = vrot.slane %v4338_v43, 5  ;;  %v1316_v39 = vshll.u32 %v4084_v45, 16  ;;  %v2915_v50 = vld [vmem:[%s3784_s4 + $0x60] sm:$0xf] }
  0xa4   : > { %v2448_v55 = vsel %vm3978_vm7, %v2446_v6, %v2447_v42  ;;  %v1303_v19 = vor.u32 %v1302_v33, %v1299_v7  ;;  %v3062_v43 = vcombine.low %v2438_v53, %v2441_v57  ;;  %v2454_v11 = vrot.slane %v4380_v46, 5  ;;  %v4752_v33 = vld [vmem:[#allocation5_spill] sm:$0xff] }
  0xa5   : > { %v1313_v10 = vor.u32 %v1312_v36, %v4529_v25  ;;  %v1345_v15 = vshrl.u32 %v2912_v26, 16  ;;  %v1348_v41 = vshll.u32 %v2912_v26, 16  ;;  %v1354_v40 = vshll.u32 %v4110_v17, 16 }
  0xa6   : > { %3303 = vmatmul.mubr.msk.bf16.gmra.mrb[8].mxu0 %vm435_vm3, %v3033_v52  ;;  %v3047_v52 = vld [vmem:[%s3784_s4 + $0x3c] sm:$0xe]  ;;  %v2453_v4 = vrot.slane %v2451_v31, 4  ;;  %v1318_v47 = vrot.slane %v1316_v39, 5  ;;  %v2461_v58 = vrot.slane %v4385_v63, 5  ;;  %v2465_v63 = vrot.slane %v4370_v27, 5 }
  0xa7   : > { %3306 = vmatprep.mubr.msk.bf16.mxu0 %vm435_vm3, %v3034_v18  ;;  %v3055_v45 = vrot.slane %v3047_v52, 9  ;;  %v3063_v18 = vcombine.low %v2445_v21, %v2448_v55  ;;  %v1314_v49 = vrot.slane %v1313_v10, 4  ;;  %v1347_v46 = vrot.slane %v1345_v15, 4  ;;  %v3050_v27 = vld [vmem:[%s3784_s4 + $0x60] sm:$0xe] }
  0xa8   : > { %3223 = vmatmul.mubr.msk.bf16.vlgmr.msra.gmra.mrb[0].mxu1 %vm435_vm3, %v3559_v59  ;;  %v1358_v59 = vshrl.u32 %v4110_v17, 16  ;;  %v1350_v54 = vrot.slane %v1348_v41, 5  ;;  %v1356_v48 = vrot.slane %v1354_v40, 5  ;;  %v2455_v29 = vsel %vm3978_vm7, %v2453_v4, %v2454_v11  ;;  %v3565_v52 = vld [vmem:[%s3784_s4 + $0x60] sm:$0xff]  }
  0xa9   : > { %3329 = vmatpush3.bf16.msra.mxu1 %v3768_v3  ;;  %3226 = vmatprep.mubr.msk.bf16.mxu1 %vm435_vm3, %v3560_v51  ;;  %v4526_v3 = vcombine.low %v1333_v9, %v1343_v44  ;;  %v2458_v44 = vrot.slane %v4349_v16, 5  ;;  %v3056_v51 = vrot.slane %v3048_v38, 9  ;;  %v1304_v16 = vrot.slane %v1303_v19, 4  ;;  %v4751_v9 = vld [vmem:[#allocation6_spill] sm:$0xff] }
  0xaa   : > { %v1360_v62 = vrot.slane %v1358_v59, 4  ;;  %v2452_v17 = vsel %vm3978_vm7, %v3055_v45, %v2451_v31  ;;  %v1319_v1 = vsel %vm3823_vm4, %v1314_v49, %v1318_v47  ;;  %v1369_v34 = vshrl.u32 %v2915_v50, 16  ;;  %v3051_v47 = vld [vmem:[%s3784_s4 + $0x6c] sm:$0xe]  ;;  %s2796_s4 = sshll.u32 %s175_s29, 7 }
  0xab   : > { %v2460_v30 = vrot.slane %v2458_v44, 4  ;;  %v2459_v35 = vsel %vm3978_vm7, %v3056_v51, %v2458_v44  ;;  %v1309_v14 = vsel %vm3823_vm4, %v1304_v16, %v4529_v25  ;;  %v1372_v2 = vshll.u32 %v2915_v50, 16  ;;  %s4630_s7 = scalar_lea.vmem [#allocation2], %s2796_s4  ;;  %s3571_s4 = sshll.u32 %s3663_s28, 4  ;;  %s3572_s4 = int_to_ptr.vmem [resolvable:$false] %s3571_s4 }
  0xac   : > { %v1382_v6 = vshrl.u32 %v4751_v9, 16  ;;  %v3064_v42 = vcombine.low %v2452_v17, %v2455_v29  ;;  %v1361_v7 = vor.u32 %v1360_v62, %v1356_v48  ;;  %v1364_v25 = vshll.u32 %v4752_v33, 16  ;;  %s2705_s16 = sshll.u32 %s4630_s7, 4  ;;  %s3573_s5 = scalar_lea.vmem %s3572_s4, 4096  ;;  %s4666_s16 = int_to_ptr.vmem [resolvable:$true] %s2705_s16 }
  0xad   : > { %v2462_v13 = vsel %vm3978_vm7, %v2460_v30, %v2461_v58  ;;  %v2467_v53 = vrot.slane %v2465_v63, 4  ;;  %v2468_v57 = vrot.slane %v4423_v56, 5  ;;  %v2923_v21 = vcombine.low %v1309_v14, %v1319_v1  ;;  %s3567_s27 = scalar_lea.vmem %s4666_s16, 2048  ;;  %p3574_p2 = scmp.lt.s32.totalorder %s4666_s16, %s3572_s4 }
  0xae   : > { %3307 = vmatmul.mubr.msk.bf16.gmra.mrb[12].mxu0 %vm435_vm3, %v3035_v61  ;;  %v1378_v61 = vshll.u32 %v4751_v9, 16  ;;  %v3065_v36 = vcombine.low %v2459_v35, %v2462_v13  ;;  %v3058_v31 = vrot.slane %v3050_v27, 9  ;;  %v2475_v26 = vrot.slane %v4444_v28, 5  ;;  %p3568_p13 = scmp.ne.s32.totalorder %s4666_s16, %s3567_s27  ;;  %p3575_p4 = scmp.lt.s32.totalorder %s3573_s5, %s3567_s27 }
  0xaf   : > { %3312 = vmatprep.mubr.msk.bf16.mxu0 %vm435_vm3, %v3061_v0  ;;  %v2472_v0 = vrot.slane %v4750_v8, 5  ;;  %v1371_v55 = vrot.slane %v1369_v34, 4  ;;  %v1374_v19 = vrot.slane %v1372_v2, 5  ;;  %v1384_v38 = vrot.slane %v1382_v6, 4 }
  0xb0   : > { %3227 = vmatmul.mubr.msk.bf16.gmra.mrb[4].mxu1 %vm435_vm3, %v3561_v22  ;;  %v1351_v22 = vor.u32 %v1350_v54, %v1347_v46  ;;  %v1380_v10 = vrot.slane %v1378_v61, 5  ;;  %v1366_v45 = vrot.slane %v1364_v25, 5  ;;  %v2469_v28 = vsel %vm3978_vm7, %v2467_v53, %v2468_v57  ;;  %p3569_p0 = pnand %p3568_p13, %p3737_p3  ;;  %p3576_p5 = por %p3575_p4, %p3574_p2 }
  0xb1   : > { %3230 = vmatprep.mubr.msk.bf16.mxu1 %vm435_vm3, %v3562_v20  ;;  %v3057_v20 = vrot.slane %v3049_v24, 9  ;;  %v2474_v39 = vrot.slane %v2472_v0, 4  ;;  %v2473_v11 = vsel %vm3978_vm7, %v3058_v31, %v2472_v0  ;;  %v2479_v15 = vrot.slane %v4432_v12, 5 }
  0xb2   : > { %v1352_v44 = vrot.slane %v1351_v22, 4  ;;  %v1375_v40 = vor.u32 %v1374_v19, %v1371_v55  ;;  %v1385_v59 = vor.u32 %v1384_v38, %v1380_v10  ;;  %v3059_v30 = vrot.slane %v3051_v47, 9  ;;  %p3570_p1 = pneg %p3569_p0 }
  0xb3   : > { %v2466_v56 = vsel %vm3978_vm7, %v3057_v20, %v2465_v63  ;;  %v2476_v41 = vsel %vm3978_vm7, %v2474_v39, %v2475_v26  ;;  %v2481_v12 = vrot.slane %v2479_v15, 4  ;;  %v2482_v58 = vrot.slane %v4473_v60, 5 }
  0xb4   : > { %v1357_v51 = vsel %vm3823_vm4, %v1352_v44, %v1356_v48  ;;  %v3066_v16 = vcombine.low %v2466_v56, %v2469_v28  ;;  %v3067_v49 = vcombine.low %v2473_v11, %v2476_v41  ;;  %v1376_v46 = vrot.slane %v1375_v40, 4  ;;  %p3577_p6 = pnand %p3576_p5, %p3570_p1 }
  0xb5   : > { %v1386_v54 = vrot.slane %v1385_v59, 4  ;;  %v2480_v48 = vsel %vm3978_vm7, %v3059_v30, %v2479_v15  ;;  %v2483_v50 = vsel %vm3978_vm7, %v2481_v12, %v2482_v58 }
  0xb6   : > { %3313 = vmatmul.mubr.msk.bf16.vlgmr.msra.gmra.mrb[0].mxu0 %vm435_vm3, %v3062_v43  ;;  %v1362_v43 = vrot.slane %v1361_v7, 4  ;;  %v1381_v60 = vsel %vm3823_vm4, %v1376_v46, %v1380_v10  ;;  %v3068_v29 = vcombine.low %v2480_v48, %v2483_v50 }
  0xb7   : > { %3316 = vmatprep.mubr.msk.bf16.mxu0 %vm435_vm3, %v3063_v18  ;;  %v4753_v18 = vld [vmem:[#allocation7_spill] sm:$0xff] }
  0xb8   : > { %3231 = vmatmul.mubr.msk.bf16.gmra.mrb[8].mxu1 %vm435_vm3, %v3563_v37  ;;  %v1388_v4 = vshll.u32 %v4753_v18, 16  ;;  %v1367_v37 = vsel %vm3823_vm4, %v1362_v43, %v1366_v45 }
  0xb9   : > { %3234 = vmatprep.mubr.msk.bf16.mxu1 %vm435_vm3, %v3564_v23  ;;  %v2925_v23 = vcombine.low %v1357_v51, %v1367_v37 }
  0xba   : > { %v1390_v62 = vrot.slane %v1388_v4, 5 }
  0xbc   : > { %v1391_v17 = vsel %vm3823_vm4, %v1386_v54, %v1390_v62 }
  0xbe   : > { %3317 = vmatmul.mubr.msk.bf16.gmra.mrb[4].mxu0 %vm435_vm3, %v3064_v42 }
  0xbf   : > { %3320 = vmatprep.mubr.msk.bf16.mxu0 %vm435_vm3, %v3065_v36 }
  0xc0   : > { %3235 = vmatmul.mubr.msk.bf16.gmra.mrb[12].mxu1 %vm435_vm3, %v3565_v52 }
  0xc1   : > { %3248 = vmatprep.mubr.msk.bf16.mxu1 %vm435_vm3, %v2923_v21 }
  0xc6   : > { %3321 = vmatmul.mubr.msk.bf16.gmra.mrb[8].mxu0 %vm435_vm3, %v3066_v16 }
  0xc7   : > { %3324 = vmatprep.mubr.msk.bf16.mxu0 %vm435_vm3, %v3067_v49 }
  0xc8   : > { %3249 = vmatmul.mubr.msk.bf16.vlgmr.msra.gmra.mrb[8].mxu1 %vm435_vm3, %v4526_v3  ;;  %v2926_v3 = vcombine.low %v1381_v60, %v1391_v17 }
  0xc9   : > { %3252 = vmatprep.mubr.msk.bf16.mxu1 %vm435_vm3, %v2925_v23 }
  0xce   : > { %3325 = vmatmul.mubr.msk.bf16.gmra.mrb[12].mxu0 %vm435_vm3, %v3068_v29 }
  0xd0   : > { %3253 = vmatmul.mubr.msk.bf16.gmra.mrb[12].mxu1 %vm435_vm3, %v2926_v3 }
 0x17b   : > { %v3224_v35 = vpop.f32.mrb[0].mxu1 }
 0x17c   : > { %v1097_v63 = vpop.f32.mrb[1].mxu1 }
 0x17d   : > { %v3225_v5 = vpop.f32.mrb[2].mxu1 }
 0x17e   : > { %v1100_v14 = vpop.f32.mrb[3].mxu1 }
 0x183   : > { %v3228_v1 = vpop.f32.mrb[4].mxu1 }
 0x184   : > { %v1113_v13 = vpop.f32.mrb[5].mxu1 }
 0x185   : > { %v3229_v24 = vpop.f32.mrb[6].mxu1 }
 0x186   : > { %v1116_v8 = vpop.f32.mrb[7].mxu1 }
 0x189   : > { %v3314_v0 = vpop.f32.mrb[0].mxu0 }
 0x18a   : > { %v3330_v27 = vadd.f32 %v3314_v0, %v3224_v35  ;;  %v2571_v34 = vpop.f32.mrb[1].mxu0 }
 0x18b   : > { %v3331_v2 = vadd.f32 %v2571_v34, %v1097_v63  ;;  %v3315_v9 = vpop.f32.mrb[2].mxu0 }
 0x18c   : > { %v2659_v61 = vadd.f32 %v3330_v27, %v4626_v32  ;;  %v3332_v6 = vadd.f32 %v3315_v9, %v3225_v5  ;;  %v2574_v42 = vpop.f32.mrb[3].mxu0 }
 0x18d   : > { %v2657_v22 = vadd.f32 %v3331_v2, %v4626_v32  ;;  %v3333_v7 = vadd.f32 %v2574_v42, %v1100_v14 }
 0x18e   : > { %2675 = vst [vmem:[%s4630_s7 + $0x10] sm:$0xff] %v2659_v61  ;;  %v2660_v33 = vadd.f32 %v3332_v6, %v4626_v32 }
 0x18f   : > { %2673 = vst [vmem:[%s4630_s7] sm:$0xff] %v2657_v22  ;;  %v2658_v25 = vadd.f32 %v3333_v7, %v4626_v32 }
 0x190   : > { %2676 = vst [vmem:[%s4630_s7 + $0x18] sm:$0xff] %v2660_v33 }
 0x191   : > { %2674 = vst [vmem:[%s4630_s7 + $0x8] sm:$0xff] %v2658_v25  ;;  %v3318_v36 = vpop.f32.mrb[4].mxu0 }
 0x192   : > { %v3334_v20 = vadd.f32 %v3318_v36, %v3228_v1  ;;  %v2587_v53 = vpop.f32.mrb[5].mxu0 }
 0x193   : > { %v3335_v57 = vadd.f32 %v2587_v53, %v1113_v13  ;;  %v3319_v52 = vpop.f32.mrb[6].mxu0 }
 0x194   : > { %v2663_v21 = vadd.f32 %v3334_v20, %v4626_v32  ;;  %v3336_v31 = vadd.f32 %v3319_v52, %v3229_v24  ;;  %v2590_v39 = vpop.f32.mrb[7].mxu0 }
 0x195   : > { %v2661_v26 = vadd.f32 %v3335_v57, %v4626_v32  ;;  %v3337_v55 = vadd.f32 %v2590_v39, %v1116_v8 }
 0x196   : > { %2679 = vst [vmem:[%s4630_s7 + $0x30] sm:$0xff] %v2663_v21  ;;  %v2664_v19 = vadd.f32 %v3336_v31, %v4626_v32 }
 0x197   : > { %2677 = vst [vmem:[%s4630_s7 + $0x20] sm:$0xff] %v2661_v26  ;;  %v2662_v10 = vadd.f32 %v3337_v55, %v4626_v32 }
 0x198   : > { %2680 = vst [vmem:[%s4630_s7 + $0x38] sm:$0xff] %v2664_v19 }
 0x199   : > { %2678 = vst [vmem:[%s4630_s7 + $0x28] sm:$0xff] %v2662_v10  ;;  %v3322_v38 = vpop.f32.mrb[8].mxu0 }
 0x19a   : > { %v2603_v43 = vpop.f32.mrb[9].mxu0 }
 0x19b   : > { %v3250_v44 = vpop.f32.mrb[8].mxu1  ;;  %v3323_v28 = vpop.f32.mrb[10].mxu0 }
 0x19c   : > { %v3338_v45 = vadd.f32 %v3322_v38, %v3250_v44  ;;  %v1511_v56 = vpop.f32.mrb[9].mxu1  ;;  %v2606_v41 = vpop.f32.mrb[11].mxu0 }
 0x19d   : > { %v3339_v11 = vadd.f32 %v2603_v43, %v1511_v56  ;;  %v3251_v15 = vpop.f32.mrb[10].mxu1 }
 0x19e   : > { %v2667_v40 = vadd.f32 %v3338_v45, %v4626_v32  ;;  %v3340_v59 = vadd.f32 %v3323_v28, %v3251_v15  ;;  %v1514_v18 = vpop.f32.mrb[11].mxu1 }
 0x19f   : > { %v2665_v4 = vadd.f32 %v3339_v11, %v4626_v32  ;;  %v3341_v47 = vadd.f32 %v2606_v41, %v1514_v18 }
 0x1a0   : > { %2683 = vst [vmem:[%s4630_s7 + $0x50] sm:$0xff] %v2667_v40  ;;  %v2668_v51 = vadd.f32 %v3340_v59, %v4626_v32 }
 0x1a1   : > { %2681 = vst [vmem:[%s4630_s7 + $0x40] sm:$0xff] %v2665_v4  ;;  %v2666_v37 = vadd.f32 %v3341_v47, %v4626_v32  ;;  %v3326_v16 = vpop.f32.mrb[12].mxu0 }
 0x1a2   : > { %2684 = vst [vmem:[%s4630_s7 + $0x58] sm:$0xff] %v2668_v51  ;;  %v2619_v30 = vpop.f32.mrb[13].mxu0 }
 0x1a3   : > { %2682 = vst [vmem:[%s4630_s7 + $0x48] sm:$0xff] %v2666_v37  ;;  %v3254_v49 = vpop.f32.mrb[12].mxu1  ;;  %v3327_v23 = vpop.f32.mrb[14].mxu0 }
 0x1a4   : > { %v3342_v12 = vadd.f32 %v3326_v16, %v3254_v49  ;;  %v1527_v58 = vpop.f32.mrb[13].mxu1  ;;  %v2622_v62 = vpop.f32.mrb[15].mxu0 }
 0x1a5   : > { %v3343_v46 = vadd.f32 %v2619_v30, %v1527_v58  ;;  %v3255_v54 = vpop.f32.mrb[14].mxu1 }
 0x1a6   : > { %v2671_v48 = vadd.f32 %v3342_v12, %v4626_v32  ;;  %v3344_v50 = vadd.f32 %v3327_v23, %v3255_v54  ;;  %v1530_v60 = vpop.f32.mrb[15].mxu1 }
 0x1a7   : > { %v2669_v17 = vadd.f32 %v3343_v46, %v4626_v32  ;;  %v3345_v29 = vadd.f32 %v2622_v62, %v1530_v60 }
 0x1a8   : > { %2687 = vst [vmem:[%s4630_s7 + $0x70] sm:$0xff] %v2671_v48  ;;  %v2672_v3 = vadd.f32 %v3344_v50, %v4626_v32 }
 0x1a9   : > { %2685 = vst [vmem:[%s4630_s7 + $0x60] sm:$0xff] %v2669_v17  ;;  %v2670_v35 = vadd.f32 %v3345_v29, %v4626_v32 }
 0x1aa   : > { %2688 = vst [vmem:[%s4630_s7 + $0x78] sm:$0xff] %v2672_v3 }
 0x1ab   : > { %2686 = vst [vmem:[%s4630_s7 + $0x68] sm:$0xff] %v2670_v35 }
 0x1ac   : > { %3580 = shalt.err (!%p3577_p6)
}
 0x1ad   : > { %s3581_s29 = scalar_lea.hbm %s4664_s21, 2048  ;;  %s3585_s8 = scalar_lea.hbm %s4729_s3, 8192 }
 0x1ae   : > { %p3582_p7 = scmp.ne.s32.totalorder %s4664_s21, %s3581_s29  ;;  %p3586_p11 = scmp.lt.u32.totalorder %s4664_s21, %s4729_s3 }
 0x1af   : > { %p3587_p12 = scmp.lt.u32.totalorder %s3585_s8, %s3581_s29  ;;  %p3589_p0 = scmp.lt.u32.totalorder %s3581_s29, %s4664_s21 }
 0x1b0   : > { %p3583_p9 = pnand %p3582_p7, %p3737_p3 }
 0x1b1   : > { %p3588_p13 = por %p3587_p12, %p3586_p11 }
 0x1b2   : > { %p3584_p10 = pneg %p3583_p9 }
 0x1b3   : > { %p3590_p1 = por %p3589_p0, %p3588_p13 }
 0x1b5   : > { %p3591_p2 = pnand %p3590_p1, %p3584_p10 }
 0x1b7   : > { %3594 = shalt.err (!%p3591_p2)
}
 0x1b8   : > { %s3664_s15 = smov 128   ;;  %s3665_s11 = smov 8  }
 0x1b9   : > { %3469 = dma.vmem_to_hbm [thread:$0]  (%p3737_p3), %s4666_s16, 2048, %s4664_s21, %s4674_s24, %s3664_s15, %s3664_s15, %s3665_s11  }
 0x1ba PF: > { %p3475_p4 = scmp.ge.s32.totalorder %s3661_s19, 2  ;;  %s2720_s20 = sand.u32 1, %s3633_s12  }
 0x1bb   : > { %s2721_s27 = scalar_lea.sflag [#allocation3], %s2720_s20 }
 0x1bc   : > { %p3472_p5 = pnand %p3475_p4, %p3746_p8 }
 0x1be   : > { %3628 = dma.done.wait (!%p3472_p5), %s2721_s27, 2048  }
 0x1bf   : > { %3630 = vsyncadd (!%p3472_p5), %s2721_s27, 4294965248  ;;  %s16_s19 = sadd.s32 1, %s3661_s19   ;;  %s4754_s12 = smov %s3637_s13 }
 0x1c0   : > { %p13_p6 = scmp.ge.s32.totalorder %s16_s19, 6   ;;  %s4755_s13 = smov %s3641_s14 }
 0x1c1   : > { %s4756_s14 = smov %s3755_s30  ;;  %s4757_s15 = smov %s3653_s17 }
 0x1c2   : > { %s4758_s16 = smov %s3657_s18  ;;  %s4759_s17 = smov %s4762_s22 }
 0x1c3   : > { %s4760_s18 = smov %s4766_s23  ;;  %15 = sbr.rel (!%p13_p6) target bundleno = 5 (0x5), region = 78 }
 0x1ca   :  { %2726 = vsyncpa [#allocation3], 1 }
 0x1cb   :  { %2728 = vsyncpa [#allocation3 + $0x1], 1 }

</bundles_post_ra>
